<compile_context>
chip_gen: v5e
topology: v5e:2x2
jax: 0.10.0
libtpu: 0.0.40
codegen_flags: <defaults>
</compile_context>

<pallas_src>
import jax
import jax.numpy as jnp
from jax.experimental import pallas as pl
from jax.experimental.pallas import tpu as pltpu

HIDDEN = 20            # hidden_size_for_lstm
INTERNAL = 5           # internal_hidden_dimension
HIDDEN_PAD = 128       # each gate gets its own 128-lane tile (whole-vreg views)
GATES_PAD = 4 * HIDDEN_PAD
OUT_PAD = 128          # lane-dense output block; wrapper slices [:, :O]
MAX_BATCH_TILE = 256   # whole MXU pass on v6e/v7x; multiple of 128 for v5e


def _round_up(n, m):
    return ((n + m - 1) // m) * m


def _choose_tiling(batch):
    """Pick (batch tile, padded batch). Tile is a multiple of 8, as tall as
    possible (up to MAX_BATCH_TILE); once the batch is large enough we keep
    >= 2 blocks so the "parallel" grid axis can use both v7x TensorCores
    (on v5e/v6e a single big block is fine)."""
    nblocks = max(1, pl.cdiv(batch, MAX_BATCH_TILE))
    if nblocks == 1 and batch > 64:
        nblocks = 2
    tile = min(MAX_BATCH_TILE, _round_up(pl.cdiv(batch, nblocks), 8))
    return tile, _round_up(batch, tile)


def lstm_predictor_kernel(x_ref, wih_ref, whh_ref, b_ref, wout_ref, bout_ref,
                          out_ref, xproj_ref):
    """One batch block of LSTM -> last step -> folded Linear.

    x_ref:     (1, T*TB, I)  time-major, block-contiguous input (row = t*TB+b)
    wih_ref:   (I, 4*HP)     fused input->gate weights, bf16; gate k occupies
                             lanes [k*HP, k*HP+H); g columns pre-scaled by 2
    whh_ref:   (HP, 4*HP)    fused hidden->gate weights, bf16 (same layout)
    b_ref:     (1, 4*HP)     b_ih + b_hh, f32 (g slice pre-scaled by 2)
    wout_ref:  (HP, OP)      folded Linear(20,5)@Linear(5,O) weight, f32
    bout_ref:  (1, OP)       folded bias, f32
    out_ref:   (TB, OP)      lane-dense output block
    xproj_ref: (T*TB, 4*HP)  f32 VMEM scratch for the hoisted input projection
    """
    TB = out_ref.shape[0]
    T = x_ref.shape[1] // TB
    HP = whh_ref.shape[0]

    whh = whh_ref[...]

    # Hoisted input projection for all T steps as ONE tall bf16 matmul (off the
    # serial recurrence chain), stored to VMEM scratch so per-step vreg live
    # ranges stay short even at TB=256.
    x2d = x_ref[0].astype(jnp.bfloat16)                       # (T*TB, I)
    xproj_ref[...] = jnp.dot(x2d, wih_ref[...],
                             preferred_element_type=jnp.float32) + b_ref[...]

    h = jnp.zeros((TB, HP), jnp.float32)
    c = jnp.zeros((TB, HP), jnp.float32)

    # Fully unrolled recurrence (T is a trace-time constant): one bf16 MXU
    # matmul, one sigmoid over the 4-gate slab, one tanh, and a few VPU ops per
    # step.  Gate slices are whole-vreg lane views (no XLU rotate) since each
    # gate sits in its own 128-lane tile.  Lane padding stays exactly zero
    # through the recurrence (zero pre-activations -> 0.5 gates multiplying a
    # zero cell state), so padded h rows never pollute the matmul.
    for t in range(T):
        z = xproj_ref[pl.ds(t * TB, TB), :] + jnp.dot(
            h.astype(jnp.bfloat16), whh, preferred_element_type=jnp.float32)
        s = jax.nn.sigmoid(z)                          # one EUP pass over 4*HP
        i_g = s[:, 0 * HP:1 * HP]
        f_g = s[:, 1 * HP:2 * HP]
        g_g = 2.0 * s[:, 2 * HP:3 * HP] - 1.0          # tanh(g); cols pre-scaled
        o_g = s[:, 3 * HP:4 * HP]
        c = f_g * c + i_g * g_g
        h = o_g * jnp.tanh(c)

    # ExtractTensorAfterLSTM (final h) -> folded Linear(20,5)+Linear(5,O),
    # written as a lane-dense (TB, 128) block (no masked stores).
    out_ref[...] = (jnp.dot(h, wout_ref[...], preferred_element_type=jnp.float32)
                    + bout_ref[...]).astype(out_ref.dtype)


def lstm_predictor_forward(x, kernel_params, output_size):
    """x: (B, T, I) float32, batch_first (matching PyTorch). Returns (B, O)."""
    wih, whh, b, wout, bout = kernel_params
    B, T, I = x.shape

    TB, Bp = _choose_tiling(B)
    nb = Bp // TB
    if Bp != B:
        x = jnp.pad(x, ((0, Bp - B), (0, 0), (0, 0)))  # no ragged/garbage rows

    # Time-major, block-contiguous layout: block bi holds rows t*TB + b_local,
    # so the kernel's fused input projection is one tall matmul and every
    # per-step slice is a contiguous, sublane-aligned view. Pure layout
    # plumbing on a tiny tensor (no compute hoisted out of the kernel).
    xb = (jnp.transpose(x, (1, 0, 2))        # (T, Bp, I)
          .reshape(T, nb, TB, I)
          .transpose(1, 0, 2, 3)
          .reshape(nb, T * TB, I))

    # Untiled VMEM residency for the constant weights: a single VMEM copy for
    # the whole grid (no per-step weight DMA / double-buffering).
    vmem = pl.BlockSpec(memory_space=pltpu.MemorySpace.VMEM)

    # Explicit VMEM budget (relevant once TB/T are scaled; v7x has only 64 MiB
    # physical / 32 MiB default scoped).
    vmem_bytes = (2 * T * TB * I * 4                    # x block (double-buffered)
                  + T * TB * GATES_PAD * 4              # xproj scratch
                  + (I + HIDDEN_PAD) * GATES_PAD * 2    # bf16 gate weights
                  + (GATES_PAD + HIDDEN_PAD * OUT_PAD + OUT_PAD) * 4
                  + 2 * TB * OUT_PAD * 4)               # out block (double-buffered)
    vmem_limit = int(max(32 << 20, min(100 << 20, 2 * vmem_bytes)))

    out_padded = pl.pallas_call(
        lstm_predictor_kernel,
        out_shape=jax.ShapeDtypeStruct((Bp, OUT_PAD), jnp.float32),
        grid=(nb,),
        in_specs=[pl.BlockSpec((1, T * TB, I), lambda bi: (bi, 0, 0))] + [vmem] * 5,
        out_specs=pl.BlockSpec((TB, OUT_PAD), lambda bi: (bi, 0)),
        scratch_shapes=[pltpu.VMEM((T * TB, GATES_PAD), jnp.float32)],
        compiler_params=pltpu.CompilerParams(
            dimension_semantics=("parallel",),
            vmem_limit_bytes=vmem_limit),
    )(xb, wih, whh, b, wout, bout)
    return out_padded[:B, :output_size]


def init_raw_params(key, input_size, output_size):
    """PyTorch-style uniform(-1/sqrt(fan), 1/sqrt(fan)) init, PyTorch layouts."""
    H, D1, O = HIDDEN, INTERNAL, output_size
    ks = jax.random.split(key, 8)
    k_lstm = 1.0 / jnp.sqrt(H)
    w_ih = jax.random.uniform(ks[0], (4 * H, input_size), jnp.float32, -k_lstm, k_lstm)
    w_hh = jax.random.uniform(ks[1], (4 * H, H), jnp.float32, -k_lstm, k_lstm)
    b_ih = jax.random.uniform(ks[2], (4 * H,), jnp.float32, -k_lstm, k_lstm)
    b_hh = jax.random.uniform(ks[3], (4 * H,), jnp.float32, -k_lstm, k_lstm)
    k1 = 1.0 / jnp.sqrt(H)
    lin1_w = jax.random.uniform(ks[4], (D1, H), jnp.float32, -k1, k1)
    lin1_b = jax.random.uniform(ks[5], (D1,), jnp.float32, -k1, k1)
    k2 = 1.0 / jnp.sqrt(D1)
    lin2_w = jax.random.uniform(ks[6], (O, D1), jnp.float32, -k2, k2)
    lin2_b = jax.random.uniform(ks[7], (O,), jnp.float32, -k2, k2)
    return (w_ih, w_hh, b_ih, b_hh, lin1_w, lin1_b, lin2_w, lin2_b)


def _pack_gates(w, n_in):
    """(4H, n_in) PyTorch gate-stacked [i|f|g|o] weight -> (n_in, 4*HP),
    gate k in lanes [k*HP, k*HP+H), g-gate columns pre-scaled by 2."""
    w4 = jnp.transpose(w.reshape(4, HIDDEN, n_in), (2, 0, 1))     # (n_in, 4, H)
    w4 = w4.at[:, 2, :].multiply(2.0)                             # tanh via sigmoid
    w4 = jnp.pad(w4, ((0, 0), (0, 0), (0, HIDDEN_PAD - HIDDEN)))
    return w4.reshape(n_in, 4 * HIDDEN_PAD)


def pack_kernel_params(raw, input_size, output_size):
    """Repack PyTorch-layout params into the fused/padded kernel layouts.

    * Gates [i|f|g|o] each occupy their own 128-lane tile -> in-kernel gate
      slices are whole-vreg views (no XLU rotates on the recurrence chain).
    * g-gate columns/bias pre-scaled by 2: tanh(g) = 2*sigmoid(2g) - 1.
    * The two output Linear layers compose exactly (no activation between
      them) and are folded into one lane-dense (HP, 128) weight + bias.
    * Recurrence MXU operands (W_ih, W_hh) stored as bf16; f32 accumulation.
    """
    w_ih, w_hh, b_ih, b_hh, lin1_w, lin1_b, lin2_w, lin2_b = raw
    H, HP, OP, O = HIDDEN, HIDDEN_PAD, OUT_PAD, output_size

    wih_k = _pack_gates(w_ih, input_size).astype(jnp.bfloat16)           # (I, 4HP)
    whh_k = jnp.pad(_pack_gates(w_hh, H),
                    ((0, HP - H), (0, 0))).astype(jnp.bfloat16)          # (HP, 4HP)
    b_k = _pack_gates((b_ih + b_hh).reshape(4 * H, 1), 1)                # (1, 4HP) f32

    w_fold = lin1_w.T @ lin2_w.T                                         # (H, O)
    b_fold = lin1_b @ lin2_w.T + lin2_b                                  # (O,)
    wout_k = jnp.zeros((HP, OP), jnp.float32).at[:H, :O].set(w_fold)
    bout_k = jnp.zeros((1, OP), jnp.float32).at[0, :O].set(b_fold)
    return (wih_k, whh_k, b_k, wout_k, bout_k)


def reference_forward(x, raw):
    """Pure-JAX f32 reference matching PyTorch nn.LSTM + Linear + Linear."""
    w_ih, w_hh, b_ih, b_hh, lin1_w, lin1_b, lin2_w, lin2_b = raw
    B, T, _ = x.shape
    H = w_hh.shape[1]
    h = jnp.zeros((B, H), jnp.float32)
    c = jnp.zeros((B, H), jnp.float32)
    for t in range(T):
        gates = x[:, t, :] @ w_ih.T + b_ih + h @ w_hh.T + b_hh
        i, f, g, o = jnp.split(gates, 4, axis=-1)
        i, f, o = jax.nn.sigmoid(i), jax.nn.sigmoid(f), jax.nn.sigmoid(o)
        g = jnp.tanh(g)
        c = f * c + i * g
        h = o * jnp.tanh(c)
    y = h @ lin1_w.T + lin1_b
    return y @ lin2_w.T + lin2_b


if __name__ == "__main__":
    B, T, INPUT_SIZE, OUTPUT_SIZE = 2, 8, 4, 3

    key = jax.random.PRNGKey(0)
    k_x, k_p = jax.random.split(key)
    x = jax.random.normal(k_x, (B, T, INPUT_SIZE), jnp.float32)

    raw = init_raw_params(k_p, INPUT_SIZE, OUTPUT_SIZE)
    kernel_params = pack_kernel_params(raw, INPUT_SIZE, OUTPUT_SIZE)

    out = lstm_predictor_forward(x, kernel_params, OUTPUT_SIZE)
    out = jax.block_until_ready(out)

    ref = reference_forward(x, raw)
    assert out.shape == (B, OUTPUT_SIZE)
    # Tolerance accounts for bf16 MXU operands in the gate matmuls (weights and
    # activations rounded to bf16, f32 accumulation); typical error at these
    # sizes is ~1e-3, so the bound below leaves ample margin.
    assert jnp.allclose(out, ref, atol=5e-2, rtol=5e-2), (out, ref)

    print("KERNEL_OK")
</pallas_src>

<mosaic_0001>
module attributes {stable_mosaic.version = 11 : i64} {
  func.func @lstm_predictor_kernel(%arg0: i32, %arg1: memref<1x64x4xf32, #tpu.memory_space<vmem>>, %arg2: memref<4x512xbf16, #tpu.memory_space<vmem>>, %arg3: memref<128x512xbf16, #tpu.memory_space<vmem>>, %arg4: memref<1x512xf32, #tpu.memory_space<vmem>>, %arg5: memref<128x128xf32, #tpu.memory_space<vmem>>, %arg6: memref<1x128xf32, #tpu.memory_space<vmem>>, %arg7: memref<8x128xf32, #tpu.memory_space<vmem>>, %arg8: memref<64x512xf32, #tpu.memory_space<vmem>>) attributes {dimension_semantics = [#tpu.dimension_semantics<parallel>], iteration_bounds = array<i64: 1>, scalar_prefetch = 0 : i64, scratch_operands = 1 : i64, tpu.core_type = #tpu.core_type<tc>, window_params = [{transform_indices = @transform_0, window_bounds = array<i64: 1, 64, 4>}, {pipeline_mode = #tpu.pipeline_mode<synchronous>, transform_indices = @transform_1, window_bounds = array<i64: 4, 512>}, {pipeline_mode = #tpu.pipeline_mode<synchronous>, transform_indices = @transform_2, window_bounds = array<i64: 128, 512>}, {pipeline_mode = #tpu.pipeline_mode<synchronous>, transform_indices = @transform_3, window_bounds = array<i64: 1, 512>}, {pipeline_mode = #tpu.pipeline_mode<synchronous>, transform_indices = @transform_4, window_bounds = array<i64: 128, 128>}, {pipeline_mode = #tpu.pipeline_mode<synchronous>, transform_indices = @transform_5, window_bounds = array<i64: 1, 128>}, {transform_indices = @transform_6, window_bounds = array<i64: 8, 128>}]} {
    %c0 = arith.constant 0 : index
    %c0_0 = arith.constant 0 : index
    %0 = vector.load %arg3[%c0, %c0_0] : memref<128x512xbf16, #tpu.memory_space<vmem>>, vector<128x512xbf16>
    %c0_1 = arith.constant 0 : index
    %c0_2 = arith.constant 0 : index
    %c0_3 = arith.constant 0 : index
    %1 = vector.load %arg1[%c0_1, %c0_2, %c0_3] : memref<1x64x4xf32, #tpu.memory_space<vmem>>, vector<1x64x4xf32>
    %2 = vector.shape_cast %1 : vector<1x64x4xf32> to vector<64x4xf32>
    %3 = arith.truncf %2 : vector<64x4xf32> to vector<64x4xbf16>
    %c0_4 = arith.constant 0 : index
    %c0_5 = arith.constant 0 : index
    %4 = vector.load %arg2[%c0_4, %c0_5] : memref<4x512xbf16, #tpu.memory_space<vmem>>, vector<4x512xbf16>
    %cst = arith.constant dense<0.000000e+00> : vector<64x512xf32>
    %5 = tpu.matmul %3, %4, %cst {dimension_numbers = #tpu.dot_dimension_numbers<[1], [0], [0], [1], [0, 0, 1, 1], [], []>} : vector<64x4xbf16>, vector<4x512xbf16>, vector<64x512xf32> -> vector<64x512xf32>
    %c0_6 = arith.constant 0 : index
    %c0_7 = arith.constant 0 : index
    %6 = vector.load %arg4[%c0_6, %c0_7] : memref<1x512xf32, #tpu.memory_space<vmem>>, vector<1x512xf32>
    %7 = vector.broadcast %6 : vector<1x512xf32> to vector<64x512xf32>
    %8 = arith.addf %5, %7 : vector<64x512xf32>
    %c0_8 = arith.constant 0 : index
    %c0_9 = arith.constant 0 : index
    %9 = vector.load %arg8[%c0_8, %c0_9] : memref<64x512xf32, #tpu.memory_space<vmem>>, vector<64x512xf32>
    tpu.vector_store %arg8[%c0_8, %c0_9], %8 {strides = array<i32>} : memref<64x512xf32, #tpu.memory_space<vmem>>, vector<64x512xf32>,
    %cst_10 = arith.constant 0.000000e+00 : f32
    %10 = vector.broadcast %cst_10 : f32 to vector<8x128xf32>
    %cst_11 = arith.constant 0.000000e+00 : f32
    %11 = vector.broadcast %cst_11 : f32 to vector<8x128xf32>
    %c0_12 = arith.constant 0 : index
    %c0_13 = arith.constant 0 : index
    %12 = vector.load %arg8[%c0_12, %c0_13] : memref<64x512xf32, #tpu.memory_space<vmem>>, vector<8x512xf32>
    %13 = arith.truncf %10 : vector<8x128xf32> to vector<8x128xbf16>
    %cst_14 = arith.constant dense<0.000000e+00> : vector<8x512xf32>
    %14 = tpu.matmul %13, %0, %cst_14 {dimension_numbers = #tpu.dot_dimension_numbers<[1], [0], [0], [1], [0, 0, 1, 1], [], []>} : vector<8x128xbf16>, vector<128x512xbf16>, vector<8x512xf32> -> vector<8x512xf32>
    %15 = arith.addf %12, %14 : vector<8x512xf32>
    %16 = arith.negf %15 : vector<8x512xf32>
    %17 = math.exp %16 : vector<8x512xf32>
    %cst_15 = arith.constant 1.000000e+00 : f32
    %18 = vector.broadcast %cst_15 : f32 to vector<8x512xf32>
    %19 = arith.addf %18, %17 : vector<8x512xf32>
    %20 = arith.divf %18, %19 : vector<8x512xf32>
    %21 = vector.extract_strided_slice %20 {offsets = [0, 0], sizes = [8, 128], strides = [1, 1]} : vector<8x512xf32> to vector<8x128xf32>
    %22 = vector.extract_strided_slice %20 {offsets = [0, 128], sizes = [8, 128], strides = [1, 1]} : vector<8x512xf32> to vector<8x128xf32>
    %23 = vector.extract_strided_slice %20 {offsets = [0, 256], sizes = [8, 128], strides = [1, 1]} : vector<8x512xf32> to vector<8x128xf32>
    %cst_16 = arith.constant 2.000000e+00 : f32
    %24 = vector.broadcast %cst_16 : f32 to vector<8x128xf32>
    %25 = arith.mulf %24, %23 : vector<8x128xf32>
    %cst_17 = arith.constant 1.000000e+00 : f32
    %26 = vector.broadcast %cst_17 : f32 to vector<8x128xf32>
    %27 = arith.subf %25, %26 : vector<8x128xf32>
    %28 = vector.extract_strided_slice %20 {offsets = [0, 384], sizes = [8, 128], strides = [1, 1]} : vector<8x512xf32> to vector<8x128xf32>
    %29 = arith.mulf %22, %11 : vector<8x128xf32>
    %30 = arith.mulf %21, %27 : vector<8x128xf32>
    %31 = arith.addf %29, %30 : vector<8x128xf32>
    %32 = math.tanh %31 : vector<8x128xf32>
    %33 = arith.mulf %28, %32 : vector<8x128xf32>
    %c8 = arith.constant 8 : index
    %c0_18 = arith.constant 0 : index
    %34 = vector.load %arg8[%c8, %c0_18] : memref<64x512xf32, #tpu.memory_space<vmem>>, vector<8x512xf32>
    %35 = arith.truncf %33 : vector<8x128xf32> to vector<8x128xbf16>
    %cst_19 = arith.constant dense<0.000000e+00> : vector<8x512xf32>
    %36 = tpu.matmul %35, %0, %cst_19 {dimension_numbers = #tpu.dot_dimension_numbers<[1], [0], [0], [1], [0, 0, 1, 1], [], []>} : vector<8x128xbf16>, vector<128x512xbf16>, vector<8x512xf32> -> vector<8x512xf32>
    %37 = arith.addf %34, %36 : vector<8x512xf32>
    %38 = arith.negf %37 : vector<8x512xf32>
    %39 = math.exp %38 : vector<8x512xf32>
    %cst_20 = arith.constant 1.000000e+00 : f32
    %40 = vector.broadcast %cst_20 : f32 to vector<8x512xf32>
    %41 = arith.addf %40, %39 : vector<8x512xf32>
    %42 = arith.divf %40, %41 : vector<8x512xf32>
    %43 = vector.extract_strided_slice %42 {offsets = [0, 0], sizes = [8, 128], strides = [1, 1]} : vector<8x512xf32> to vector<8x128xf32>
    %44 = vector.extract_strided_slice %42 {offsets = [0, 128], sizes = [8, 128], strides = [1, 1]} : vector<8x512xf32> to vector<8x128xf32>
    %45 = vector.extract_strided_slice %42 {offsets = [0, 256], sizes = [8, 128], strides = [1, 1]} : vector<8x512xf32> to vector<8x128xf32>
    %cst_21 = arith.constant 2.000000e+00 : f32
    %46 = vector.broadcast %cst_21 : f32 to vector<8x128xf32>
    %47 = arith.mulf %46, %45 : vector<8x128xf32>
    %cst_22 = arith.constant 1.000000e+00 : f32
    %48 = vector.broadcast %cst_22 : f32 to vector<8x128xf32>
    %49 = arith.subf %47, %48 : vector<8x128xf32>
    %50 = vector.extract_strided_slice %42 {offsets = [0, 384], sizes = [8, 128], strides = [1, 1]} : vector<8x512xf32> to vector<8x128xf32>
    %51 = arith.mulf %44, %31 : vector<8x128xf32>
    %52 = arith.mulf %43, %49 : vector<8x128xf32>
    %53 = arith.addf %51, %52 : vector<8x128xf32>
    %54 = math.tanh %53 : vector<8x128xf32>
    %55 = arith.mulf %50, %54 : vector<8x128xf32>
    %c16 = arith.constant 16 : index
    %c0_23 = arith.constant 0 : index
    %56 = vector.load %arg8[%c16, %c0_23] : memref<64x512xf32, #tpu.memory_space<vmem>>, vector<8x512xf32>
    %57 = arith.truncf %55 : vector<8x128xf32> to vector<8x128xbf16>
    %cst_24 = arith.constant dense<0.000000e+00> : vector<8x512xf32>
    %58 = tpu.matmul %57, %0, %cst_24 {dimension_numbers = #tpu.dot_dimension_numbers<[1], [0], [0], [1], [0, 0, 1, 1], [], []>} : vector<8x128xbf16>, vector<128x512xbf16>, vector<8x512xf32> -> vector<8x512xf32>
    %59 = arith.addf %56, %58 : vector<8x512xf32>
    %60 = arith.negf %59 : vector<8x512xf32>
    %61 = math.exp %60 : vector<8x512xf32>
    %cst_25 = arith.constant 1.000000e+00 : f32
    %62 = vector.broadcast %cst_25 : f32 to vector<8x512xf32>
    %63 = arith.addf %62, %61 : vector<8x512xf32>
    %64 = arith.divf %62, %63 : vector<8x512xf32>
    %65 = vector.extract_strided_slice %64 {offsets = [0, 0], sizes = [8, 128], strides = [1, 1]} : vector<8x512xf32> to vector<8x128xf32>
    %66 = vector.extract_strided_slice %64 {offsets = [0, 128], sizes = [8, 128], strides = [1, 1]} : vector<8x512xf32> to vector<8x128xf32>
    %67 = vector.extract_strided_slice %64 {offsets = [0, 256], sizes = [8, 128], strides = [1, 1]} : vector<8x512xf32> to vector<8x128xf32>
    %cst_26 = arith.constant 2.000000e+00 : f32
    %68 = vector.broadcast %cst_26 : f32 to vector<8x128xf32>
    %69 = arith.mulf %68, %67 : vector<8x128xf32>
    %cst_27 = arith.constant 1.000000e+00 : f32
    %70 = vector.broadcast %cst_27 : f32 to vector<8x128xf32>
    %71 = arith.subf %69, %70 : vector<8x128xf32>
    %72 = vector.extract_strided_slice %64 {offsets = [0, 384], sizes = [8, 128], strides = [1, 1]} : vector<8x512xf32> to vector<8x128xf32>
    %73 = arith.mulf %66, %53 : vector<8x128xf32>
    %74 = arith.mulf %65, %71 : vector<8x128xf32>
    %75 = arith.addf %73, %74 : vector<8x128xf32>
    %76 = math.tanh %75 : vector<8x128xf32>
    %77 = arith.mulf %72, %76 : vector<8x128xf32>
    %c24 = arith.constant 24 : index
    %c0_28 = arith.constant 0 : index
    %78 = vector.load %arg8[%c24, %c0_28] : memref<64x512xf32, #tpu.memory_space<vmem>>, vector<8x512xf32>
    %79 = arith.truncf %77 : vector<8x128xf32> to vector<8x128xbf16>
    %cst_29 = arith.constant dense<0.000000e+00> : vector<8x512xf32>
    %80 = tpu.matmul %79, %0, %cst_29 {dimension_numbers = #tpu.dot_dimension_numbers<[1], [0], [0], [1], [0, 0, 1, 1], [], []>} : vector<8x128xbf16>, vector<128x512xbf16>, vector<8x512xf32> -> vector<8x512xf32>
    %81 = arith.addf %78, %80 : vector<8x512xf32>
    %82 = arith.negf %81 : vector<8x512xf32>
    %83 = math.exp %82 : vector<8x512xf32>
    %cst_30 = arith.constant 1.000000e+00 : f32
    %84 = vector.broadcast %cst_30 : f32 to vector<8x512xf32>
    %85 = arith.addf %84, %83 : vector<8x512xf32>
    %86 = arith.divf %84, %85 : vector<8x512xf32>
    %87 = vector.extract_strided_slice %86 {offsets = [0, 0], sizes = [8, 128], strides = [1, 1]} : vector<8x512xf32> to vector<8x128xf32>
    %88 = vector.extract_strided_slice %86 {offsets = [0, 128], sizes = [8, 128], strides = [1, 1]} : vector<8x512xf32> to vector<8x128xf32>
    %89 = vector.extract_strided_slice %86 {offsets = [0, 256], sizes = [8, 128], strides = [1, 1]} : vector<8x512xf32> to vector<8x128xf32>
    %cst_31 = arith.constant 2.000000e+00 : f32
    %90 = vector.broadcast %cst_31 : f32 to vector<8x128xf32>
    %91 = arith.mulf %90, %89 : vector<8x128xf32>
    %cst_32 = arith.constant 1.000000e+00 : f32
    %92 = vector.broadcast %cst_32 : f32 to vector<8x128xf32>
    %93 = arith.subf %91, %92 : vector<8x128xf32>
    %94 = vector.extract_strided_slice %86 {offsets = [0, 384], sizes = [8, 128], strides = [1, 1]} : vector<8x512xf32> to vector<8x128xf32>
    %95 = arith.mulf %88, %75 : vector<8x128xf32>
    %96 = arith.mulf %87, %93 : vector<8x128xf32>
    %97 = arith.addf %95, %96 : vector<8x128xf32>
    %98 = math.tanh %97 : vector<8x128xf32>
    %99 = arith.mulf %94, %98 : vector<8x128xf32>
    %c32 = arith.constant 32 : index
    %c0_33 = arith.constant 0 : index
    %100 = vector.load %arg8[%c32, %c0_33] : memref<64x512xf32, #tpu.memory_space<vmem>>, vector<8x512xf32>
    %101 = arith.truncf %99 : vector<8x128xf32> to vector<8x128xbf16>
    %cst_34 = arith.constant dense<0.000000e+00> : vector<8x512xf32>
    %102 = tpu.matmul %101, %0, %cst_34 {dimension_numbers = #tpu.dot_dimension_numbers<[1], [0], [0], [1], [0, 0, 1, 1], [], []>} : vector<8x128xbf16>, vector<128x512xbf16>, vector<8x512xf32> -> vector<8x512xf32>
    %103 = arith.addf %100, %102 : vector<8x512xf32>
    %104 = arith.negf %103 : vector<8x512xf32>
    %105 = math.exp %104 : vector<8x512xf32>
    %cst_35 = arith.constant 1.000000e+00 : f32
    %106 = vector.broadcast %cst_35 : f32 to vector<8x512xf32>
    %107 = arith.addf %106, %105 : vector<8x512xf32>
    %108 = arith.divf %106, %107 : vector<8x512xf32>
    %109 = vector.extract_strided_slice %108 {offsets = [0, 0], sizes = [8, 128], strides = [1, 1]} : vector<8x512xf32> to vector<8x128xf32>
    %110 = vector.extract_strided_slice %108 {offsets = [0, 128], sizes = [8, 128], strides = [1, 1]} : vector<8x512xf32> to vector<8x128xf32>
    %111 = vector.extract_strided_slice %108 {offsets = [0, 256], sizes = [8, 128], strides = [1, 1]} : vector<8x512xf32> to vector<8x128xf32>
    %cst_36 = arith.constant 2.000000e+00 : f32
    %112 = vector.broadcast %cst_36 : f32 to vector<8x128xf32>
    %113 = arith.mulf %112, %111 : vector<8x128xf32>
    %cst_37 = arith.constant 1.000000e+00 : f32
    %114 = vector.broadcast %cst_37 : f32 to vector<8x128xf32>
    %115 = arith.subf %113, %114 : vector<8x128xf32>
    %116 = vector.extract_strided_slice %108 {offsets = [0, 384], sizes = [8, 128], strides = [1, 1]} : vector<8x512xf32> to vector<8x128xf32>
    %117 = arith.mulf %110, %97 : vector<8x128xf32>
    %118 = arith.mulf %109, %115 : vector<8x128xf32>
    %119 = arith.addf %117, %118 : vector<8x128xf32>
    %120 = math.tanh %119 : vector<8x128xf32>
    %121 = arith.mulf %116, %120 : vector<8x128xf32>
    %c40 = arith.constant 40 : index
    %c0_38 = arith.constant 0 : index
    %122 = vector.load %arg8[%c40, %c0_38] : memref<64x512xf32, #tpu.memory_space<vmem>>, vector<8x512xf32>
    %123 = arith.truncf %121 : vector<8x128xf32> to vector<8x128xbf16>
    %cst_39 = arith.constant dense<0.000000e+00> : vector<8x512xf32>
    %124 = tpu.matmul %123, %0, %cst_39 {dimension_numbers = #tpu.dot_dimension_numbers<[1], [0], [0], [1], [0, 0, 1, 1], [], []>} : vector<8x128xbf16>, vector<128x512xbf16>, vector<8x512xf32> -> vector<8x512xf32>
    %125 = arith.addf %122, %124 : vector<8x512xf32>
    %126 = arith.negf %125 : vector<8x512xf32>
    %127 = math.exp %126 : vector<8x512xf32>
    %cst_40 = arith.constant 1.000000e+00 : f32
    %128 = vector.broadcast %cst_40 : f32 to vector<8x512xf32>
    %129 = arith.addf %128, %127 : vector<8x512xf32>
    %130 = arith.divf %128, %129 : vector<8x512xf32>
    %131 = vector.extract_strided_slice %130 {offsets = [0, 0], sizes = [8, 128], strides = [1, 1]} : vector<8x512xf32> to vector<8x128xf32>
    %132 = vector.extract_strided_slice %130 {offsets = [0, 128], sizes = [8, 128], strides = [1, 1]} : vector<8x512xf32> to vector<8x128xf32>
    %133 = vector.extract_strided_slice %130 {offsets = [0, 256], sizes = [8, 128], strides = [1, 1]} : vector<8x512xf32> to vector<8x128xf32>
    %cst_41 = arith.constant 2.000000e+00 : f32
    %134 = vector.broadcast %cst_41 : f32 to vector<8x128xf32>
    %135 = arith.mulf %134, %133 : vector<8x128xf32>
    %cst_42 = arith.constant 1.000000e+00 : f32
    %136 = vector.broadcast %cst_42 : f32 to vector<8x128xf32>
    %137 = arith.subf %135, %136 : vector<8x128xf32>
    %138 = vector.extract_strided_slice %130 {offsets = [0, 384], sizes = [8, 128], strides = [1, 1]} : vector<8x512xf32> to vector<8x128xf32>
    %139 = arith.mulf %132, %119 : vector<8x128xf32>
    %140 = arith.mulf %131, %137 : vector<8x128xf32>
    %141 = arith.addf %139, %140 : vector<8x128xf32>
    %142 = math.tanh %141 : vector<8x128xf32>
    %143 = arith.mulf %138, %142 : vector<8x128xf32>
    %c48 = arith.constant 48 : index
    %c0_43 = arith.constant 0 : index
    %144 = vector.load %arg8[%c48, %c0_43] : memref<64x512xf32, #tpu.memory_space<vmem>>, vector<8x512xf32>
    %145 = arith.truncf %143 : vector<8x128xf32> to vector<8x128xbf16>
    %cst_44 = arith.constant dense<0.000000e+00> : vector<8x512xf32>
    %146 = tpu.matmul %145, %0, %cst_44 {dimension_numbers = #tpu.dot_dimension_numbers<[1], [0], [0], [1], [0, 0, 1, 1], [], []>} : vector<8x128xbf16>, vector<128x512xbf16>, vector<8x512xf32> -> vector<8x512xf32>
    %147 = arith.addf %144, %146 : vector<8x512xf32>
    %148 = arith.negf %147 : vector<8x512xf32>
    %149 = math.exp %148 : vector<8x512xf32>
    %cst_45 = arith.constant 1.000000e+00 : f32
    %150 = vector.broadcast %cst_45 : f32 to vector<8x512xf32>
    %151 = arith.addf %150, %149 : vector<8x512xf32>
    %152 = arith.divf %150, %151 : vector<8x512xf32>
    %153 = vector.extract_strided_slice %152 {offsets = [0, 0], sizes = [8, 128], strides = [1, 1]} : vector<8x512xf32> to vector<8x128xf32>
    %154 = vector.extract_strided_slice %152 {offsets = [0, 128], sizes = [8, 128], strides = [1, 1]} : vector<8x512xf32> to vector<8x128xf32>
    %155 = vector.extract_strided_slice %152 {offsets = [0, 256], sizes = [8, 128], strides = [1, 1]} : vector<8x512xf32> to vector<8x128xf32>
    %cst_46 = arith.constant 2.000000e+00 : f32
    %156 = vector.broadcast %cst_46 : f32 to vector<8x128xf32>
    %157 = arith.mulf %156, %155 : vector<8x128xf32>
    %cst_47 = arith.constant 1.000000e+00 : f32
    %158 = vector.broadcast %cst_47 : f32 to vector<8x128xf32>
    %159 = arith.subf %157, %158 : vector<8x128xf32>
    %160 = vector.extract_strided_slice %152 {offsets = [0, 384], sizes = [8, 128], strides = [1, 1]} : vector<8x512xf32> to vector<8x128xf32>
    %161 = arith.mulf %154, %141 : vector<8x128xf32>
    %162 = arith.mulf %153, %159 : vector<8x128xf32>
    %163 = arith.addf %161, %162 : vector<8x128xf32>
    %164 = math.tanh %163 : vector<8x128xf32>
    %165 = arith.mulf %160, %164 : vector<8x128xf32>
    %c56 = arith.constant 56 : index
    %c0_48 = arith.constant 0 : index
    %166 = vector.load %arg8[%c56, %c0_48] : memref<64x512xf32, #tpu.memory_space<vmem>>, vector<8x512xf32>
    %167 = arith.truncf %165 : vector<8x128xf32> to vector<8x128xbf16>
    %cst_49 = arith.constant dense<0.000000e+00> : vector<8x512xf32>
    %168 = tpu.matmul %167, %0, %cst_49 {dimension_numbers = #tpu.dot_dimension_numbers<[1], [0], [0], [1], [0, 0, 1, 1], [], []>} : vector<8x128xbf16>, vector<128x512xbf16>, vector<8x512xf32> -> vector<8x512xf32>
    %169 = arith.addf %166, %168 : vector<8x512xf32>
    %170 = arith.negf %169 : vector<8x512xf32>
    %171 = math.exp %170 : vector<8x512xf32>
    %cst_50 = arith.constant 1.000000e+00 : f32
    %172 = vector.broadcast %cst_50 : f32 to vector<8x512xf32>
    %173 = arith.addf %172, %171 : vector<8x512xf32>
    %174 = arith.divf %172, %173 : vector<8x512xf32>
    %175 = vector.extract_strided_slice %174 {offsets = [0, 0], sizes = [8, 128], strides = [1, 1]} : vector<8x512xf32> to vector<8x128xf32>
    %176 = vector.extract_strided_slice %174 {offsets = [0, 128], sizes = [8, 128], strides = [1, 1]} : vector<8x512xf32> to vector<8x128xf32>
    %177 = vector.extract_strided_slice %174 {offsets = [0, 256], sizes = [8, 128], strides = [1, 1]} : vector<8x512xf32> to vector<8x128xf32>
    %cst_51 = arith.constant 2.000000e+00 : f32
    %178 = vector.broadcast %cst_51 : f32 to vector<8x128xf32>
    %179 = arith.mulf %178, %177 : vector<8x128xf32>
    %cst_52 = arith.constant 1.000000e+00 : f32
    %180 = vector.broadcast %cst_52 : f32 to vector<8x128xf32>
    %181 = arith.subf %179, %180 : vector<8x128xf32>
    %182 = vector.extract_strided_slice %174 {offsets = [0, 384], sizes = [8, 128], strides = [1, 1]} : vector<8x512xf32> to vector<8x128xf32>
    %183 = arith.mulf %176, %163 : vector<8x128xf32>
    %184 = arith.mulf %175, %181 : vector<8x128xf32>
    %185 = arith.addf %183, %184 : vector<8x128xf32>
    %186 = math.tanh %185 : vector<8x128xf32>
    %187 = arith.mulf %182, %186 : vector<8x128xf32>
    %c0_53 = arith.constant 0 : index
    %c0_54 = arith.constant 0 : index
    %188 = vector.load %arg5[%c0_53, %c0_54] : memref<128x128xf32, #tpu.memory_space<vmem>>, vector<128x128xf32>
    %cst_55 = arith.constant dense<0.000000e+00> : vector<8x128xf32>
    %189 = tpu.matmul %187, %188, %cst_55 {dimension_numbers = #tpu.dot_dimension_numbers<[1], [0], [0], [1], [0, 0, 1, 1], [], []>} : vector<8x128xf32>, vector<128x128xf32>, vector<8x128xf32> -> vector<8x128xf32>
    %c0_56 = arith.constant 0 : index
    %c0_57 = arith.constant 0 : index
    %190 = vector.load %arg6[%c0_56, %c0_57] : memref<1x128xf32, #tpu.memory_space<vmem>>, vector<1x128xf32>
    %191 = vector.broadcast %190 : vector<1x128xf32> to vector<8x128xf32>
    %192 = arith.addf %189, %191 : vector<8x128xf32>
    %c0_58 = arith.constant 0 : index
    %c0_59 = arith.constant 0 : index
    %193 = vector.load %arg7[%c0_58, %c0_59] : memref<8x128xf32, #tpu.memory_space<vmem>>, vector<8x128xf32>
    tpu.vector_store %arg7[%c0_58, %c0_59], %192 {strides = array<i32>} : memref<8x128xf32, #tpu.memory_space<vmem>>, vector<8x128xf32>,
    return
  }
  func.func @transform_0(%arg0: i32) -> (i32, i32, i32) {
    %c0_i32 = arith.constant 0 : i32
    %c0_i32_0 = arith.constant 0 : i32
    %c0_i32_1 = arith.constant 0 : i32
    return %arg0, %c0_i32, %c0_i32_0 : i32, i32, i32
  }
  func.func @transform_1(%arg0: i32) -> (i32, i32) {
    %c0_i32 = arith.constant 0 : i32
    %c0_i32_0 = arith.constant 0 : i32
    %c0_i32_1 = arith.constant 0 : i32
    return %c0_i32, %c0_i32_0 : i32, i32
  }
  func.func @transform_2(%arg0: i32) -> (i32, i32) {
    %c0_i32 = arith.constant 0 : i32
    %c0_i32_0 = arith.constant 0 : i32
    %c0_i32_1 = arith.constant 0 : i32
    return %c0_i32, %c0_i32_0 : i32, i32
  }
  func.func @transform_3(%arg0: i32) -> (i32, i32) {
    %c0_i32 = arith.constant 0 : i32
    %c0_i32_0 = arith.constant 0 : i32
    %c0_i32_1 = arith.constant 0 : i32
    return %c0_i32, %c0_i32_0 : i32, i32
  }
  func.func @transform_4(%arg0: i32) -> (i32, i32) {
    %c0_i32 = arith.constant 0 : i32
    %c0_i32_0 = arith.constant 0 : i32
    %c0_i32_1 = arith.constant 0 : i32
    return %c0_i32, %c0_i32_0 : i32, i32
  }
  func.func @transform_5(%arg0: i32) -> (i32, i32) {
    %c0_i32 = arith.constant 0 : i32
    %c0_i32_0 = arith.constant 0 : i32
    %c0_i32_1 = arith.constant 0 : i32
    return %c0_i32, %c0_i32_0 : i32, i32
  }
  func.func @transform_6(%arg0: i32) -> (i32, i32) {
    %c0_i32 = arith.constant 0 : i32
    %c0_i32_0 = arith.constant 0 : i32
    return %arg0, %c0_i32 : i32, i32
  }
}

</mosaic_0001>

<bundles_post_ra>
// kernel: tpu_custom_call.1
= control target key start
LH: loop header
LB: loop body
LE: loop exit
PB: predicated region body
PF: predicated region fallthrough
CT: control target
= control target key end

     0   :  { %11 = vsyncpa [#allocation4], 0  ;;  %s2753_s0 = inlined_call_operand.vmem [shape: f32[1,64,4], index: 0, kind: input, shape index: {}]   ;;  %s2754_s1 = inlined_call_operand.vmem [shape: bf16[4,512], index: 1, kind: input, shape index: {}]   ;;  %s2755_s2 = inlined_call_operand.hbm [shape: bf16[128,512], index: 2, kind: input, shape index: {}]   ;;  %s2756_s3 = inlined_call_operand.vmem [shape: f32[1,512], index: 3, kind: input, shape index: {}]   ;;  %s2757_s4 = inlined_call_operand.hbm [shape: f32[128,128], index: 4, kind: input, shape index: {}]   ;;  %s2758_s5 = inlined_call_operand.vmem [shape: f32[1,128], index: 5, kind: input, shape index: {}]   ;;  %s2759_s6 = inlined_call_operand.hbm [shape: f32[8,128], index: 6, kind: output, shape index: {}]  }
   0x1   :  { %12 = vsyncpa [#allocation7], 0 }
   0x2   :  { %13 = vsyncpa [#allocation5], 0  ;;  %s22_s23 = sshll.u32 %s2755_s2, 4  ;;  %s2106_s24 = smov [#allocation3]   ;;  %s23_s23 = int_to_ptr.hbm [resolvable:$true] %s22_s23 }
   0x3   :  { %s24_s25 = sshll.u32 %s2106_s24, 4  ;;  %s37_s28 = sshll.u32 %s2757_s4, 4  ;;  %s25_s25 = int_to_ptr.vmem [resolvable:$true] %s24_s25  ;;  %s38_s28 = int_to_ptr.hbm [resolvable:$true] %s37_s28 }
   0x4   :  { %s2107_s29 = smov 256   ;;  %s2108_s30 = smov 16  }
   0x5   :  { %30 = dma.hbm_to_vmem [thread:$0]  %s23_s23, 4096, %s25_s25, [#allocation4], %s2107_s29, %s2107_s29, %s2108_s30  }
   0x6   :  { %s2109_s7 = smov [#allocation6]   ;;  %s2110_s9 = smov 128  }
   0x7   :  { %s39_s8 = sshll.u32 %s2109_s7, 4  ;;  %s2111_s10 = smov 8   ;;  %s40_s8 = int_to_ptr.vmem [resolvable:$true] %s39_s8 }
   0x8   :  { %45 = dma.hbm_to_vmem [thread:$0]  %s38_s28, 2048, %s40_s8, [#allocation7], %s2110_s9, %s2110_s9, %s2111_s10  }
   0x9   :  { %2100 = dma.done.wait [#allocation4], 4096  }
   0xa   :  { %2101 = vsyncadd [#allocation4], 4294963200 }
   0xb   :  { %2102 = dma.done.wait [#allocation7], 2048  }
   0xc   :  { %2103 = vsyncadd [#allocation7], 4294965248  ;;  %v101_v0 = vld [vmem:[%s2754_s1] sm:$0xff]  ;;  %v90_v2 = vld [vmem:[%s2753_s0 + $0x8] sm:$0xff]  ;;  %vm131_vm0 = vcmask 1041408   ;;  %vm118_vm1 = vcmask 31744  }
   0xd   :  { %113 = vst [vmem:[#allocation1] ss:$4 sm:$0xff] %v101_v0  ;;  %v89_v1 = vld [vmem:[%s2753_s0] sm:$0xff]  ;;  %v95_v3 = vld [vmem:[%s2753_s0 + $0x30] sm:$0xff]  ;;  %v96_v4 = vld [vmem:[%s2753_s0 + $0x38] sm:$0xff]  ;;  %s2113_s28 = smov [#allocation8]  }
   0xe   :  { %v1796_v5 = vld [vmem:[#allocation3 + $0xe8] sm:$0xf]  ;;  %v1873_v6 = vld [vmem:[#allocation3 + $0xf4] sm:$0xf0]  ;;  %v1870_v7 = vld [vmem:[#allocation3 + $0xe4] sm:$0xf]  ;;  %v2174_v21 = vpack.c.bf16 %v90_v2, %v89_v1  ;;  %v2176_v22 = vpack.c.bf16 %v96_v4, %v95_v3 }
   0xf   :  { %v1790_v8 = vld [vmem:[#allocation3 + $0xf0] sm:$0xf0]  ;;  %v1788_v9 = vld [vmem:[#allocation3 + $0xe0] sm:$0xf]  ;;  %v1780_v10 = vld [vmem:[#allocation3 + $0xc8] sm:$0xf]  ;;  %v2170_v17 = vor.u32 %v1873_v6, %v1796_v5 }
  0x10   :  { %v1869_v11 = vld [vmem:[#allocation3 + $0xd4] sm:$0xf0]  ;;  %v1872_v12 = vld [vmem:[#allocation3 + $0xec] sm:$0xf0]  ;;  %v1871_v13 = vld [vmem:[#allocation3 + $0xec] sm:$0xf]  ;;  %v2180_v26 = vor.u32 %v1870_v7, %v1790_v8 }
  0x11   :  { %v1798_v14 = vld [vmem:[#allocation3 + $0xf8] sm:$0xf0]  ;;  %v2182_v27 = vor.u32 %v1872_v12, %v1788_v9  ;;  %v1772_v28 = vld [vmem:[#allocation3 + $0xc0] sm:$0xf]  ;;  %v1868_v29 = vld [vmem:[#allocation3 + $0xcc] sm:$0xf0]  ;;  %v2185_v30 = vor.u32 %v1869_v11, %v1780_v10 }
  0x12   :  { %v2187_v31 = vor.u32 %v1871_v13, %v1798_v14  ;;  %v1764_v32 = vld [vmem:[#allocation3 + $0xa8] sm:$0xf]  ;;  %v1866_v33 = vld [vmem:[#allocation3 + $0xc4] sm:$0xf]  ;;  %v1774_v34 = vld [vmem:[#allocation3 + $0xd0] sm:$0xf0]  ;;  %v2199_v38 = vor.u32 %v1868_v29, %v1772_v28 }
  0x13   :  { %v1865_v35 = vld [vmem:[#allocation3 + $0xb4] sm:$0xf0]  ;;  %v1867_v36 = vld [vmem:[#allocation3 + $0xcc] sm:$0xf]  ;;  %v1782_v37 = vld [vmem:[#allocation3 + $0xd8] sm:$0xf0]  ;;  %v2201_v39 = vor.u32 %v1866_v33, %v1774_v34 }
  0x14   :  { %v114_v15 = vld.sshfl [vmem:[#allocation1] sm:$0xff pattern:$0x73625140]  ;;  %v116_v16 = vld.sshfl [vmem:[#allocation1 + $0x10] sm:$0xff pattern:$0x73625140]  ;;  %v2205_v42 = vor.u32 %v1865_v35, %v1764_v32  ;;  %v2207_v43 = vor.u32 %v1867_v36, %v1782_v37 }
  0x15   :  { %v132_v18 = vsel %vm131_vm0, %v114_v15, 0  ;;  %v136_v19 = vsel %vm131_vm0, %v116_v16, 0  ;;  %v117_v20 = vld.sshfl [vmem:[#allocation1 + $0x18] sm:$0xff pattern:$0x73625140]  ;;  %v91_v62 = vld [vmem:[%s2753_s0 + $0x10] sm:$0xff] }
  0x16   :  { %147 = vmatpush.bf16.msra.mxu0 %v132_v18  ;;  %1874 = vmatpush.bf16.msra.mxu1 %v132_v18  ;;  %v138_v23 = vsel %vm131_vm0, %v117_v20, 0  ;;  %v115_v24 = vld.sshfl [vmem:[#allocation1 + $0x8] sm:$0xff pattern:$0x73625140]  ;;  %v1864_v41 = vld [vmem:[#allocation3 + $0xac] sm:$0xf0] }
  0x17   :  { %205 = vmatpush.bf16.msra.mxu2 %v136_v19  ;;  %234 = vmatpush.bf16.msra.mxu3 %v138_v23  ;;  %v134_v25 = vsel %vm131_vm0, %v115_v24, 0  ;;  %v1756_v40 = vld [vmem:[#allocation3 + $0xa0] sm:$0xf]  ;;  %v1748_v44 = vld [vmem:[#allocation3 + $0x88] sm:$0xf]  ;;  %v92_v63 = vld [vmem:[%s2753_s0 + $0x18] sm:$0xff] }
  0x18   :  { %v1862_v45 = vld [vmem:[#allocation3 + $0xa4] sm:$0xf]  ;;  %v1758_v46 = vld [vmem:[#allocation3 + $0xb0] sm:$0xf0]  ;;  %v1861_v47 = vld [vmem:[#allocation3 + $0x94] sm:$0xf0]  ;;  %v2211_v50 = vor.u32 %v1864_v41, %v1756_v40  ;;  %v2239_v6 = vpack.c.bf16 %v92_v63, %v91_v62 }
  0x19   :  { %1658 = vmatmul.msk.bf16.vlgmr.msra.gmra.mxu0 %vm118_vm1, %v2174_v21  ;;  %1661 = vmatmul.msk.bf16.vlgmr.msra.gmra.mxu1 %vm118_vm1, %v2176_v22  ;;  %v1863_v48 = vld [vmem:[#allocation3 + $0xac] sm:$0xf]  ;;  %v1766_v49 = vld [vmem:[#allocation3 + $0xb8] sm:$0xf0]  ;;  %v1740_v51 = vld [vmem:[#allocation3 + $0x80] sm:$0xf]  ;;  %v2213_v53 = vor.u32 %v1862_v45, %v1758_v46  ;;  %v2217_v55 = vor.u32 %v1861_v47, %v1748_v44 }
  0x1a   :  { %176 = vmatpush.bf16.msrb.mxu1 %v134_v25  ;;  %1666 = vmatmul.msk.bf16.vlgmr.msra.gmra.mxu2 %vm118_vm1, %v2174_v21  ;;  %v1860_v52 = vld [vmem:[#allocation3 + $0x8c] sm:$0xf0]  ;;  %v1732_v54 = vld [vmem:[#allocation3 + $0x68] sm:$0xf]  ;;  %v2219_v56 = vor.u32 %v1863_v48, %v1766_v49  ;;  %v1858_v57 = vld [vmem:[#allocation3 + $0x84] sm:$0xf] }
  0x1b   :  { %478 = vmatpush.bf16.msrb.mxu2 %v2170_v17  ;;  %1670 = vmatmul.msk.bf16.vlgmr.msra.gmra.mxu3 %vm118_vm1, %v2174_v21  ;;  %v1742_v58 = vld [vmem:[#allocation3 + $0x90] sm:$0xf0]  ;;  %v1857_v59 = vld [vmem:[#allocation3 + $0x74] sm:$0xf0]  ;;  %v1859_v60 = vld [vmem:[#allocation3 + $0x8c] sm:$0xf]  ;;  %v2228_v0 = vor.u32 %v1860_v52, %v1740_v51 }
  0x1c   :  { %452 = vmatpush.bf16.msrb.mxu0 %v2182_v27  ;;  %491 = vmatpush.bf16.msrb.mxu3 %v2187_v31  ;;  %v1750_v61 = vld [vmem:[#allocation3 + $0x98] sm:$0xf0]  ;;  %v2231_v1 = vor.u32 %v1858_v57, %v1742_v58  ;;  %v1724_v2 = vld [vmem:[#allocation3 + $0x60] sm:$0xf]  ;;  %v1856_v3 = vld [vmem:[#allocation3 + $0x6c] sm:$0xf0]  ;;  %v2235_v4 = vor.u32 %v1857_v59, %v1732_v54 }
  0x1d   :  { %v2237_v5 = vor.u32 %v1859_v60, %v1750_v61  ;;  %v1716_v7 = vld [vmem:[#allocation3 + $0x48] sm:$0xf]  ;;  %v1853_v8 = vld [vmem:[#allocation3 + $0x54] sm:$0xf0]  ;;  %v2242_v9 = vor.u32 %v1856_v3, %v1724_v2  ;;  %v1708_v10 = vld [vmem:[#allocation3 + $0x40] sm:$0xf] }
  0x1e   :  { %465 = vmatpush.bf16.msra.mxu1 %v2180_v26  ;;  %v1852_v11 = vld [vmem:[#allocation3 + $0x4c] sm:$0xf0]  ;;  %v2247_v12 = vor.u32 %v1853_v8, %v1716_v7  ;;  %v1855_v13 = vld [vmem:[#allocation3 + $0x6c] sm:$0xf]  ;;  %v1734_v14 = vld [vmem:[#allocation3 + $0x78] sm:$0xf0] }
  0x1f   :  { %479 = vmatpush.bf16.msrb.mxu2 %v2185_v30  ;;  %v2253_v15 = vor.u32 %v1855_v13, %v1734_v14  ;;  %v1692_v16 = vld [vmem:[#allocation3 + $0x20] sm:$0xf]  ;;  %v1848_v18 = vld [vmem:[#allocation3 + $0x2c] sm:$0xf0]  ;;  %v1854_v19 = vld [vmem:[#allocation3 + $0x64] sm:$0xf]  ;;  %v2260_v24 = vor.u32 %v1852_v11, %v1708_v10 }
  0x20   :  { %453 = vmatpush.bf16.msrb.mxu0 %v2199_v38  ;;  %492 = vmatpush.bf16.msrb.mxu3 %v2207_v43  ;;  %v1726_v20 = vld [vmem:[#allocation3 + $0x70] sm:$0xf0]  ;;  %v1851_v23 = vld [vmem:[#allocation3 + $0x4c] sm:$0xf]  ;;  %v1700_v28 = vld [vmem:[#allocation3 + $0x28] sm:$0xf]  ;;  %v2274_v45 = vor.u32 %v1848_v18, %v1692_v16 }
  0x21   :  { %v2262_v25 = vor.u32 %v1854_v19, %v1726_v20  ;;  %v1849_v29 = vld [vmem:[#allocation3 + $0x34] sm:$0xf0]  ;;  %v1850_v34 = vld [vmem:[#allocation3 + $0x44] sm:$0xf]  ;;  %v1710_v35 = vld [vmem:[#allocation3 + $0x50] sm:$0xf0] }
  0x22   :  { %466 = vmatpush.bf16.msra.mxu1 %v2201_v39  ;;  %v2268_v33 = vor.u32 %v1849_v29, %v1700_v28  ;;  %v1847_v36 = vld [vmem:[#allocation3 + $0x2c] sm:$0xf]  ;;  %v2271_v37 = vor.u32 %v1850_v34, %v1710_v35  ;;  %v1702_v40 = vld [vmem:[#allocation3 + $0x38] sm:$0xf0]  ;;  %v1684_v41 = vld [vmem:[#allocation3 + $0x8] sm:$0xf] }
  0x23   :  { %480 = vmatpush.bf16.msrb.mxu2 %v2205_v42  ;;  %v1845_v44 = vld [vmem:[#allocation3 + $0x14] sm:$0xf0]  ;;  %v1676_v46 = vld [vmem:[#allocation3] sm:$0xf]  ;;  %v1844_v47 = vld [vmem:[#allocation3 + $0xc] sm:$0xf0]  ;;  %v2278_v48 = vor.u32 %v1847_v36, %v1702_v40 }
  0x24   :  { %454 = vmatpush.bf16.msrb.mxu0 %v2211_v50  ;;  %493 = vmatpush.bf16.msrb.mxu3 %v2219_v56  ;;  %v2280_v49 = vor.u32 %v1845_v44, %v1684_v41  ;;  %v1843_v51 = vld [vmem:[#allocation3 + $0xc] sm:$0xf]  ;;  %v1686_v52 = vld [vmem:[#allocation3 + $0x18] sm:$0xf0]  ;;  %v94_v57 = vld [vmem:[%s2753_s0 + $0x28] sm:$0xff]  ;;  %v2290_v58 = vor.u32 %v1844_v47, %v1676_v46  ;;  %s1645_s29 = sshll.u32 %s2113_s28, 4  ;;  %s1646_s29 = int_to_ptr.vmem [resolvable:$true] %s1645_s29 }
  0x25   :  { %v93_v54 = vld [vmem:[%s2753_s0 + $0x20] sm:$0xff]  ;;  %v2294_v59 = vor.u32 %v1843_v51, %v1686_v52  ;;  %v1846_v61 = vld [vmem:[#allocation3 + $0x24] sm:$0xf]  ;;  %v1694_v62 = vld [vmem:[#allocation3 + $0x30] sm:$0xf0]  ;;  %s1647_s8 = sshll.u32 %s2759_s6, 4  ;;  %s1648_s8 = int_to_ptr.hbm [resolvable:$true] %s1647_s8 }
  0x26   :  { %467 = vmatpush.bf16.msra.mxu1 %v2213_v53  ;;  %v99_v60 = vpack.c.bf16 %v94_v57, %v93_v54  ;;  %v2305_v63 = vor.u32 %v1846_v61, %v1694_v62  ;;  %v1842_v2 = vld [vmem:[#allocation3 + $0x4] sm:$0xf]  ;;  %v1678_v3 = vld [vmem:[#allocation3 + $0x10] sm:$0xf0] }
  0x27   :  { %481 = vmatpush.bf16.msrb.mxu2 %v2217_v55  ;;  %v2310_v7 = vor.u32 %v1842_v2, %v1678_v3 }
  0x28   :  { %455 = vmatpush.bf16.msrb.mxu0 %v2228_v0  ;;  %494 = vmatpush.bf16.msrb.mxu3 %v2237_v5 }
  0x29   :  { %1659 = vmatmul.msk.bf16.gmra.mxu0 %vm118_vm1, %v2239_v6  ;;  %1662 = vmatmul.msk.bf16.vlgmr.msrb.gmra.mxu1 %vm118_vm1, %v2174_v21  ;;  %v1718_v21 = vld [vmem:[#allocation3 + $0x58] sm:$0xf0] }
  0x2a   :  { %468 = vmatpush.bf16.msra.mxu1 %v2231_v1  ;;  %1667 = vmatmul.msk.bf16.gmra.mxu2 %vm118_vm1, %v2239_v6  ;;  %v2266_v32 = vor.u32 %v1851_v23, %v1718_v21 }
  0x2b   :  { %482 = vmatpush.bf16.msrb.mxu2 %v2235_v4  ;;  %1671 = vmatmul.msk.bf16.gmra.mxu3 %vm118_vm1, %v2239_v6 }
  0x2c   :  { %456 = vmatpush.bf16.msrb.mxu0 %v2242_v9  ;;  %495 = vmatpush.bf16.msrb.mxu3 %v2253_v15 }
  0x2e   :  { %469 = vmatpush.bf16.msra.mxu1 %v2262_v25 }
  0x2f   :  { %483 = vmatpush.bf16.msrb.mxu2 %v2247_v12 }
  0x30   :  { %457 = vmatpush.bf16.msrb.mxu0 %v2260_v24  ;;  %496 = vmatpush.bf16.msrb.mxu3 %v2266_v32 }
  0x32   :  { %470 = vmatpush.bf16.msra.mxu1 %v2271_v37 }
  0x33   :  { %484 = vmatpush.bf16.msrb.mxu2 %v2268_v33 }
  0x34   :  { %458 = vmatpush.bf16.msrb.mxu0 %v2274_v45  ;;  %497 = vmatpush.bf16.msrb.mxu3 %v2278_v48 }
  0x36   :  { %471 = vmatpush.bf16.msra.mxu1 %v2305_v63 }
  0x37   :  { %485 = vmatpush.bf16.msrb.mxu2 %v2280_v49 }
  0x38   :  { %459 = vmatpush.bf16.msrb.mxu0 %v2290_v58  ;;  %498 = vmatpush.bf16.msrb.mxu3 %v2294_v59 }
  0x39   :  { %1660 = vmatmul.msk.bf16.gmra.mxu0 %vm118_vm1, %v99_v60  ;;  %1663 = vmatmul.msk.bf16.gmra.mxu1 %vm118_vm1, %v2239_v6  ;;  %v2112_v6 = vmov 0  }
  0x3a   :  { %1668 = vmatmul.msk.bf16.gmra.mxu2 %vm118_vm1, %v99_v60  ;;  %472 = vmatpush.bf16.msra.mxu1 %v2310_v7 }
  0x3b   :  { %622 = vmatpush.bf16.msra.mxu2 %v2170_v17  ;;  %1672 = vmatmul.msk.bf16.gmra.mxu3 %vm118_vm1, %v99_v60 }
  0x3c   :  { %596 = vmatpush.bf16.msra.mxu0 %v2182_v27  ;;  %635 = vmatpush.bf16.msra.mxu3 %v2187_v31 }
  0x3e   :  { %609 = vmatpush.bf16.msrb.mxu1 %v2180_v26 }
  0x3f   :  { %623 = vmatpush.bf16.msra.mxu2 %v2185_v30 }
  0x40   :  { %597 = vmatpush.bf16.msra.mxu0 %v2199_v38  ;;  %636 = vmatpush.bf16.msra.mxu3 %v2207_v43 }
  0x42   :  { %610 = vmatpush.bf16.msrb.mxu1 %v2201_v39 }
  0x43   :  { %624 = vmatpush.bf16.msra.mxu2 %v2205_v42 }
  0x44   :  { %598 = vmatpush.bf16.msra.mxu0 %v2211_v50  ;;  %637 = vmatpush.bf16.msra.mxu3 %v2219_v56 }
  0x46   :  { %611 = vmatpush.bf16.msrb.mxu1 %v2213_v53 }
  0x47   :  { %625 = vmatpush.bf16.msra.mxu2 %v2217_v55 }
  0x48   :  { %599 = vmatpush.bf16.msra.mxu0 %v2228_v0  ;;  %638 = vmatpush.bf16.msra.mxu3 %v2237_v5 }
  0x49   :  { %1664 = vmatmul.msk.bf16.gmra.mxu1 %vm118_vm1, %v99_v60  ;;  %460 = vmatmul.bf16.vlgmr.msrb.gmra.mxu0 %v2112_v6 }
  0x4a   :  { %1669 = vmatmul.msk.bf16.gmra.mxu2 %vm118_vm1, %v2176_v22  ;;  %612 = vmatpush.bf16.msrb.mxu1 %v2231_v1 }
  0x4b   :  { %626 = vmatpush.bf16.msra.mxu2 %v2235_v4  ;;  %1673 = vmatmul.msk.bf16.gmra.mxu3 %vm118_vm1, %v2176_v22 }
  0x4c   :  { %600 = vmatpush.bf16.msra.mxu0 %v2242_v9  ;;  %639 = vmatpush.bf16.msra.mxu3 %v2253_v15 }
  0x4e   :  { %613 = vmatpush.bf16.msrb.mxu1 %v2262_v25 }
  0x4f   :  { %627 = vmatpush.bf16.msra.mxu2 %v2247_v12 }
  0x50   :  { %601 = vmatpush.bf16.msra.mxu0 %v2260_v24  ;;  %640 = vmatpush.bf16.msra.mxu3 %v2266_v32 }
  0x52   :  { %614 = vmatpush.bf16.msrb.mxu1 %v2271_v37 }
  0x53   :  { %628 = vmatpush.bf16.msra.mxu2 %v2268_v33 }
  0x54   :  { %602 = vmatpush.bf16.msra.mxu0 %v2274_v45  ;;  %641 = vmatpush.bf16.msra.mxu3 %v2278_v48 }
  0x56   :  { %615 = vmatpush.bf16.msrb.mxu1 %v2305_v63 }
  0x57   :  { %629 = vmatpush.bf16.msra.mxu2 %v2280_v49 }
  0x58   :  { %603 = vmatpush.bf16.msra.mxu0 %v2290_v58  ;;  %642 = vmatpush.bf16.msra.mxu3 %v2294_v59 }
  0x59   :  { %1665 = vmatmul.msk.bf16.gmra.mxu1 %vm118_vm1, %v2176_v22  ;;  %v102_v22 = vld [vmem:[%s2756_s3] sm:$0xf] }
  0x5a   :  { %486 = vmatmul.bf16.vlgmr.msrb.gmra.mxu2 %v2112_v6  ;;  %616 = vmatpush.bf16.msrb.mxu1 %v2310_v7  ;;  %v2383_v8 = vperm.slane %v102_v22, 0  ;;  %v107_v23 = vperm.slane %v102_v22, 3  ;;  %v106_v21 = vperm.slane %v102_v22, 2  ;;  %v2406_v44 = vperm.slane %v102_v22, 1 }
  0x5b   :  { %499 = vmatmul.bf16.vlgmr.msrb.gmra.mxu3 %v2112_v6  ;;  %766 = vmatpush.bf16.msrb.mxu2 %v2170_v17 }
  0x5c   :  { %740 = vmatpush.bf16.msrb.mxu0 %v2182_v27  ;;  %779 = vmatpush.bf16.msrb.mxu3 %v2187_v31  ;;  %2761 = vst [vmem:[#allocation12_spill] sm:$0xff] %v2383_v8 }
  0x5f   :  { %767 = vmatpush.bf16.msrb.mxu2 %v2185_v30 }
  0x60   :  { %741 = vmatpush.bf16.msrb.mxu0 %v2199_v38  ;;  %780 = vmatpush.bf16.msrb.mxu3 %v2207_v43 }
  0x63   :  { %768 = vmatpush.bf16.msrb.mxu2 %v2205_v42 }
  0x64   :  { %742 = vmatpush.bf16.msrb.mxu0 %v2211_v50  ;;  %781 = vmatpush.bf16.msrb.mxu3 %v2219_v56 }
  0x67   :  { %769 = vmatpush.bf16.msrb.mxu2 %v2217_v55 }
  0x68   :  { %743 = vmatpush.bf16.msrb.mxu0 %v2228_v0  ;;  %782 = vmatpush.bf16.msrb.mxu3 %v2237_v5 }
  0x69   :  { %473 = vmatmul.bf16.vlgmr.msra.gmra.mxu1 %v2112_v6 }
  0x6a   :  { %753 = vmatpush.bf16.msra.mxu1 %v2180_v26 }
  0x6b   :  { %770 = vmatpush.bf16.msrb.mxu2 %v2235_v4 }
  0x6c   :  { %744 = vmatpush.bf16.msrb.mxu0 %v2242_v9  ;;  %783 = vmatpush.bf16.msrb.mxu3 %v2253_v15 }
  0x6e   :  { %754 = vmatpush.bf16.msra.mxu1 %v2201_v39 }
  0x6f   :  { %771 = vmatpush.bf16.msrb.mxu2 %v2247_v12 }
  0x70   :  { %745 = vmatpush.bf16.msrb.mxu0 %v2260_v24  ;;  %784 = vmatpush.bf16.msrb.mxu3 %v2266_v32 }
  0x72   :  { %755 = vmatpush.bf16.msra.mxu1 %v2213_v53 }
  0x73   :  { %772 = vmatpush.bf16.msrb.mxu2 %v2268_v33 }
  0x74   :  { %746 = vmatpush.bf16.msrb.mxu0 %v2274_v45  ;;  %785 = vmatpush.bf16.msrb.mxu3 %v2278_v48 }
  0x76   :  { %756 = vmatpush.bf16.msra.mxu1 %v2231_v1 }
  0x77   :  { %773 = vmatpush.bf16.msrb.mxu2 %v2280_v49 }
  0x78   :  { %747 = vmatpush.bf16.msrb.mxu0 %v2290_v58  ;;  %786 = vmatpush.bf16.msrb.mxu3 %v2294_v59 }
  0x7a   :  { %757 = vmatpush.bf16.msra.mxu1 %v2262_v25 }
  0x7e   :  { %758 = vmatpush.bf16.msra.mxu1 %v2271_v37 }
  0x82   :  { %759 = vmatpush.bf16.msra.mxu1 %v2305_v63 }
  0x86   :  { %760 = vmatpush.bf16.msra.mxu1 %v2310_v7 }
  0x96   :  { %v149_v10 = vpop.f32.mrf.mxu0  ;;  %v164_v11 = vpop.f32.mrf.mxu1 }
  0x97   :  { %v2386_v13 = vadd.f32 %v164_v11, %v2383_v8 }
  0x99   :  { %2762 = vst [vmem:[#allocation13_spill] sm:$0xff] %v2386_v13 }
  0x9d   :  { %v2388_v14 = vpop.f32.mrf.mxu2 }
  0x9e   :  { %v2390_v16 = vpop.f32.mrf.mxu3  ;;  %v151_v18 = vpop.f32.mrf.mxu0 }
  0x9f   :  { %v2392_v19 = vpop.f32.mrf.mxu1  ;;  %v2395_v20 = vadd.f32 %v151_v18, %v2383_v8 }
  0xa0   :  { %2763 = vst [vmem:[#allocation14_spill] sm:$0xff] %v2392_v19 }
  0xa5   :  { %v209_v28 = vpop.f32.mrf.mxu2 }
  0xa6   :  { %v238_v29 = vpop.f32.mrf.mxu3  ;;  %v2397_v34 = vadd.f32 %v209_v28, %v106_v21  ;;  %v154_v36 = vpop.f32.mrf.mxu0 }
  0xa7   :  { %v2399_v35 = vadd.f32 %v238_v29, %v107_v23  ;;  %v2401_v40 = vpop.f32.mrf.mxu1  ;;  %v2404_v41 = vadd.f32 %v154_v36, %v2383_v8 }
  0xad   :  { %v212_v46 = vpop.f32.mrf.mxu2 }
  0xae   :  { %v241_v47 = vpop.f32.mrf.mxu3  ;;  %v2408_v51 = vadd.f32 %v212_v46, %v106_v21  ;;  %v156_v54 = vpop.f32.mrf.mxu0 }
  0xaf   :  { %v2410_v52 = vadd.f32 %v241_v47, %v107_v23  ;;  %v180_v57 = vpop.f32.mrf.mxu1  ;;  %v2413_v60 = vadd.f32 %v156_v54, %v2383_v8 }
  0xb0   :  { %2764 = vst [vmem:[#allocation15_spill] sm:$0xff] %v2408_v51  ;;  %v2416_v61 = vadd.f32 %v180_v57, %v2406_v44 }
  0xb1   :  { %2765 = vst [vmem:[#allocation16_spill] sm:$0xff] %v2410_v52 }
  0xb2   :  { %2766 = vst [vmem:[#allocation17_spill] sm:$0xff] %v2413_v60 }
  0xb5   :  { %v214_v62 = vpop.f32.mrf.mxu2 }
  0xb6   :  { %v243_v2 = vpop.f32.mrf.mxu3  ;;  %v2418_v3 = vadd.f32 %v214_v62, %v106_v21  ;;  %v159_v22 = vpop.f32.mrf.mxu0 }
  0xb7   :  { %v2420_v6 = vadd.f32 %v243_v2, %v107_v23  ;;  %v183_v11 = vpop.f32.mrf.mxu1  ;;  %v2423_v18 = vadd.f32 %v159_v22, %v2383_v8 }
  0xb8   :  { %2767 = vst [vmem:[#allocation18_spill] sm:$0xff] %v2418_v3  ;;  %v2426_v28 = vadd.f32 %v183_v11, %v2406_v44 }
  0xb9   :  { %2768 = vst [vmem:[#allocation19_spill] sm:$0xff] %v2420_v6 }
  0xba   :  { %2769 = vst [vmem:[#allocation20_spill] sm:$0xff] %v2423_v18 }
  0xbb   :  { %2770 = vst [vmem:[#allocation21_spill] sm:$0xff] %v2426_v28 }
  0xbd   :  { %v217_v29 = vpop.f32.mrf.mxu2 }
  0xbe   :  { %v246_v36 = vpop.f32.mrf.mxu3  ;;  %v2428_v46 = vadd.f32 %v217_v29, %v106_v21  ;;  %v161_v54 = vpop.f32.mrf.mxu0 }
  0xbf   :  { %v2430_v47 = vadd.f32 %v246_v36, %v107_v23  ;;  %v185_v57 = vpop.f32.mrf.mxu1  ;;  %v2433_v62 = vadd.f32 %v161_v54, %v2383_v8  ;;  %v150_v36 = vadd.f32 %v149_v10, %v2383_v8 }
  0xc0   :  { %2771 = vst [vmem:[#allocation22_spill] sm:$0xff] %v2428_v46  ;;  %v2436_v2 = vadd.f32 %v185_v57, %v2406_v44 }
  0xc1   :  { %2772 = vst [vmem:[#allocation23_spill] sm:$0xff] %v2430_v47 }
  0xc2   :  { %2773 = vst [vmem:[#allocation24_spill] sm:$0xff] %v2433_v62 }
  0xc3   :  { %2774 = vst [vmem:[#allocation25_spill] sm:$0xff] %v2436_v2 }
  0xc5   :  { %v219_v19 = vpop.f32.mrf.mxu2 }
  0xc6   :  { %v248_v22 = vpop.f32.mrf.mxu3  ;;  %v2438_v13 = vadd.f32 %v219_v19, %v106_v21  ;;  %v461_v6 = vpop.f32.mrf.mxu0 }
  0xc7   :  { %v2440_v11 = vadd.f32 %v248_v22, %v107_v23  ;;  %v188_v18 = vpop.f32.mrf.mxu1  ;;  %v504_v54 = vadd.f32 %v461_v6, %v150_v36 }
  0xc8   :  { %2775 = vst [vmem:[#allocation26_spill] sm:$0xff] %v2438_v13  ;;  %v2443_v29 = vadd.f32 %v188_v18, %v2406_v44 }
  0xc9   :  { %2776 = vst [vmem:[#allocation27_spill] sm:$0xff] %v2440_v11  ;;  %v1802_v22 = vmul.f32 -1.442695, %v504_v54 }
  0xca   :  { %2777 = vst [vmem:[#allocation28_spill] sm:$0xff] %v2443_v29 }
  0xcb   :  { %1884 = vpow2.f32 %v1802_v22 }
  0xcd   :  { %v222_v47 = vpop.f32.mrf.mxu2 }
  0xce   :  { %v251_v46 = vpop.f32.mrf.mxu3  ;;  %v2446_v62 = vadd.f32 %v222_v47, %v106_v21  ;;  %v463_v2 = vpop.f32.mrf.mxu0 }
  0xcf   :  { %v2448_v57 = vadd.f32 %v251_v46, %v107_v23  ;;  %v190_v3 = vpop.f32.mrf.mxu1  ;;  %v208_v46 = vadd.f32 %v2388_v14, %v106_v21 }
  0xd0   :  { %2778 = vst [vmem:[#allocation29_spill] sm:$0xff] %v2446_v62  ;;  %v2451_v19 = vadd.f32 %v190_v3, %v2406_v44  ;;  %v237_v3 = vadd.f32 %v2390_v16, %v107_v23 }
  0xd1   :  { %2779 = vst [vmem:[#allocation30_spill] sm:$0xff] %v2448_v57  ;;  %v1885_v47 = vpop.eup %1884 }
  0xd2   :  { %2780 = vst [vmem:[#allocation31_spill] sm:$0xff] %v2451_v19  ;;  %v520_v57 = vadd.f32 1.0, %v1885_v47 }
  0xd4   :  { %vm529_vm6 = vweird.f32 %v520_v57 }
  0xd5   :  { %v224_v11 = vpop.f32.mrf.mxu2 }
  0xd6   :  { %v253_v13 = vpop.f32.mrf.mxu3  ;;  %v2453_v18 = vadd.f32 %v224_v11, %v106_v21 }
  0xd7   :  { %v2455_v29 = vadd.f32 %v253_v13, %v107_v23  ;;  %v193_v10 = vpop.f32.mrf.mxu1 }
  0xd8   :  { %2781 = vst [vmem:[#allocation32_spill] sm:$0xff] %v2453_v18  ;;  %v2458_v6 = vadd.f32 %v193_v10, %v2406_v44  ;;  %v179_v10 = vadd.f32 %v2401_v40, %v2406_v44 }
  0xd9   :  { %2782 = vst [vmem:[#allocation33_spill] sm:$0xff] %v2455_v29 }
  0xda   :  { %2783 = vst [vmem:[#allocation34_spill] sm:$0xff] %v2458_v6 }
  0xdd   :  { %v487_v36 = vpop.f32.mrf.mxu2 }
  0xde   :  { %v500_v2 = vpop.f32.mrf.mxu3  ;;  %v506_v8 = vadd.f32 %v487_v36, %v208_v46 }
  0xdf   :  { %v195_v54 = vpop.f32.mrf.mxu1  ;;  %v507_v13 = vadd.f32 %v500_v2, %v237_v3 }
  0xe0   :  { %v2463_v22 = vadd.f32 %v195_v54, %v2406_v44  ;;  %v1804_v11 = vmul.f32 -1.442695, %v506_v8 }
  0xe1   :  { %v1805_v29 = vmul.f32 -1.442695, %v507_v13 }
  0xe2   :  { %2784 = vst [vmem:[#allocation35_spill] sm:$0xff] %v2463_v22  ;;  %1886 = vpow2.f32 %v1804_v11 }
  0xe3   :  { %1888 = vrcp.f32 %v520_v57 }
  0xe4   :  { %1890 = vpow2.f32 %v1805_v29 }
  0xe5   :  { %v489_v18 = vpop.f32.mrf.mxu2 }
  0xe6   :  { %v502_v14 = vpop.f32.mrf.mxu3 }
  0xe7   :  { %v474_v21 = vpop.f32.mrf.mxu1 }
  0xe8   :  { %v505_v62 = vadd.f32 %v474_v21, %v179_v10  ;;  %v1887_v6 = vpop.eup %1886  ;;  %v535_v21 = vand.u32 2147483648, %v520_v57 }
  0xe9   :  { %v1889_v16 = vpop.eup %1888  ;;  %v522_v23 = vadd.f32 1.0, %v1887_v6 }
  0xea   :  { %v1803_v47 = vmul.f32 -1.442695, %v505_v62  ;;  %v525_v46 = vmul.f32 %v1889_v16, %v520_v57  ;;  %v1891_v8 = vpop.eup %1890  ;;  %vm530_vm3 = vweird.f32 %v1889_v16  ;;  %v536_v22 = vor.u32 1.1754944e-38, %v535_v21 }
  0xeb   :  { %1892 = vrcp.f32 %v522_v23  ;;  %v523_v54 = vadd.f32 1.0, %v1891_v8  ;;  %v565_v14 = vand.u32 2147483648, %v522_v23  ;;  %v563_v29 = vand.u32 2147483647, %v522_v23  ;;  %vm531_vm8 = vmor %vm529_vm6, %vm530_vm3 }
  0xec   :  { %1894 = vpow2.f32 %v1803_v47  ;;  %v526_v2 = vsub.f32 1.0, %v525_v46  ;;  %vm559_vm4 = vweird.f32 %v522_v23  ;;  %v533_v46 = vand.u32 2147483647, %v520_v57 }
  0xed   :  { %1896 = vrcp.f32 %v523_v54  ;;  %v566_v47 = vor.u32 1.1754944e-38, %v565_v14  ;;  %vm564_vm7 = vcmp.eq.f32.partialorder %v563_v29, 8.507059e+37  ;;  %vm574_vm15 = vweird.f32 %v523_v54 }
  0xee   :  { %v527_v40 = vmul.f32 %v1889_v16, %v526_v2  ;;  %vm534_vm9 = vcmp.eq.f32.partialorder %v533_v46, 8.507059e+37 }
  0xef   :  { %v476_v36 = vpop.f32.mrf.mxu1 }
  0xf0   :  { %v528_v62 = vadd.f32 %v1889_v16, %v527_v40 }
  0xf1   :  { %v1893_v3 = vpop.eup %1892 }
  0xf2   :  { %v555_v11 = vmul.f32 %v1893_v3, %v522_v23  ;;  %v1895_v13 = vpop.eup %1894  ;;  %vm560_vm2 = vweird.f32 %v1893_v3 }
  0xf3   :  { %v521_v18 = vadd.f32 1.0, %v1895_v13  ;;  %vm561_vm5 = vmor %vm559_vm4, %vm560_vm2  ;;  %v1897_v36 = vpop.eup %1896  ;;  %v532_v13 = vsel %vm531_vm8, %v1889_v16, %v528_v62 }
  0xf4   :  { %v556_v44 = vsub.f32 1.0, %v555_v11  ;;  %v570_v60 = vmul.f32 %v1897_v36, %v523_v54  ;;  %vm575_vm14 = vweird.f32 %v1897_v36 }
  0xf5   :  { %1898 = vrcp.f32 %v521_v18  ;;  %v550_v52 = vand.u32 2147483648, %v521_v18  ;;  %v548_v57 = vand.u32 2147483647, %v521_v18  ;;  %vm544_vm11 = vweird.f32 %v521_v18  ;;  %vm576_vm0 = vmor %vm574_vm15, %vm575_vm14 }
  0xf6   :  { %v557_v10 = vmul.f32 %v1893_v3, %v556_v44 }
  0xf7   :  { %vm549_vm13 = vcmp.eq.f32.partialorder %v548_v57, 8.507059e+37 }
  0xf8   :  { %v558_v6 = vadd.f32 %v1893_v3, %v557_v10  ;;  %v537_v10 = vsel %vm534_vm9, %v536_v22, %v532_v13  ;;  %v578_v22 = vand.u32 2147483647, %v523_v54 }
  0xfa   :  { %v562_v8 = vsel %vm561_vm5, %v1893_v3, %v558_v6  ;;  %v571_v3 = vsub.f32 1.0, %v570_v60  ;;  %v551_v6 = vor.u32 1.1754944e-38, %v550_v52  ;;  %vm579_vm1 = vcmp.eq.f32.partialorder %v578_v22, 8.507059e+37 }
  0xfb   :  { %v567_v2 = vsel %vm564_vm7, %v566_v47, %v562_v8  ;;  %v1899_v11 = vpop.eup %1898 }
  0xfc   :  { %v584_v44 = vmul.f32 2.0, %v567_v2  ;;  %v540_v19 = vmul.f32 %v1899_v11, %v521_v18  ;;  %vm545_vm10 = vweird.f32 %v1899_v11  ;;  %v572_v62 = vmul.f32 %v1897_v36, %v571_v3 }
  0xfd   :  { %vm546_vm12 = vmor %vm544_vm11, %vm545_vm10 }
  0xfe   :  { %v1806_v40 = vadd.f32 -1.0, %v584_v44  ;;  %v541_v23 = vsub.f32 1.0, %v540_v19  ;;  %v573_v8 = vadd.f32 %v1897_v36, %v572_v62  ;;  %v580_v19 = vand.u32 2147483648, %v523_v54 }
 0x100   :  { %v587_v51 = vmul.f32 %v1806_v40, %v537_v10  ;;  %v542_v14 = vmul.f32 %v1899_v11, %v541_v23  ;;  %v577_v60 = vsel %vm576_vm0, %v1897_v36, %v573_v8  ;;  %v581_v2 = vor.u32 1.1754944e-38, %v580_v19 }
 0x102   :  { %v543_v29 = vadd.f32 %v1899_v11, %v542_v14  ;;  %v582_v52 = vsel %vm579_vm1, %v581_v2, %v577_v60 }
 0x104   :  { %v547_v47 = vsel %vm546_vm12, %v1899_v11, %v543_v29 }
 0x105   :  { %v552_v16 = vsel %vm549_vm13, %v551_v6, %v547_v47 }
 0x106   :  { %v586_v21 = vmul.f32 0.0, %v552_v16 }
 0x108   :  { %v2467_v46 = vadd.f32 %v587_v51, %v586_v21 }
 0x10a   :  { %1900 = vtanh.f32 %v2467_v46 }
 0x110   :  { %v1901_v18 = vpop.eup %1900 }
 0x111   :  { %v590_v11 = vmul.f32 %v1901_v18, %v582_v52 }
 0x113   :  { %v595_v13 = vpack.c.bf16 %v590_v11, %v590_v11 }
 0x115   :  { %604 = vmatmul.bf16.vlgmr.msra.gmra.mxu0 %v595_v13  ;;  %617 = vmatmul.bf16.vlgmr.msrb.gmra.mxu1 %v595_v13 }
 0x116   :  { %630 = vmatmul.bf16.vlgmr.msra.gmra.mxu2 %v595_v13  ;;  %643 = vmatmul.bf16.vlgmr.msra.gmra.mxu3 %v595_v13 }
 0x117   :  { %884 = vmatpush.bf16.msra.mxu0 %v2182_v27  ;;  %897 = vmatpush.bf16.msrb.mxu1 %v2180_v26 }
 0x118   :  { %910 = vmatpush.bf16.msra.mxu2 %v2170_v17  ;;  %923 = vmatpush.bf16.msra.mxu3 %v2187_v31 }
 0x11b   :  { %885 = vmatpush.bf16.msra.mxu0 %v2199_v38  ;;  %898 = vmatpush.bf16.msrb.mxu1 %v2201_v39 }
 0x11c   :  { %911 = vmatpush.bf16.msra.mxu2 %v2185_v30  ;;  %924 = vmatpush.bf16.msra.mxu3 %v2207_v43 }
 0x11f   :  { %886 = vmatpush.bf16.msra.mxu0 %v2211_v50  ;;  %899 = vmatpush.bf16.msrb.mxu1 %v2213_v53 }
 0x120   :  { %912 = vmatpush.bf16.msra.mxu2 %v2205_v42  ;;  %925 = vmatpush.bf16.msra.mxu3 %v2219_v56 }
 0x123   :  { %887 = vmatpush.bf16.msra.mxu0 %v2228_v0  ;;  %900 = vmatpush.bf16.msrb.mxu1 %v2231_v1 }
 0x124   :  { %913 = vmatpush.bf16.msra.mxu2 %v2217_v55  ;;  %926 = vmatpush.bf16.msra.mxu3 %v2237_v5 }
 0x127   :  { %888 = vmatpush.bf16.msra.mxu0 %v2242_v9  ;;  %901 = vmatpush.bf16.msrb.mxu1 %v2262_v25 }
 0x128   :  { %914 = vmatpush.bf16.msra.mxu2 %v2235_v4  ;;  %927 = vmatpush.bf16.msra.mxu3 %v2253_v15 }
 0x12b   :  { %889 = vmatpush.bf16.msra.mxu0 %v2260_v24  ;;  %902 = vmatpush.bf16.msrb.mxu1 %v2271_v37 }
 0x12c   :  { %915 = vmatpush.bf16.msra.mxu2 %v2247_v12  ;;  %928 = vmatpush.bf16.msra.mxu3 %v2266_v32 }
 0x12f   :  { %890 = vmatpush.bf16.msra.mxu0 %v2274_v45  ;;  %903 = vmatpush.bf16.msrb.mxu1 %v2305_v63 }
 0x130   :  { %916 = vmatpush.bf16.msra.mxu2 %v2268_v33  ;;  %929 = vmatpush.bf16.msra.mxu3 %v2278_v48 }
 0x133   :  { %891 = vmatpush.bf16.msra.mxu0 %v2290_v58  ;;  %904 = vmatpush.bf16.msrb.mxu1 %v2310_v7 }
 0x134   :  { %917 = vmatpush.bf16.msra.mxu2 %v2280_v49  ;;  %930 = vmatpush.bf16.msra.mxu3 %v2294_v59 }
 0x192   :  { %v605_v51 = vpop.f32.mrf.mxu0  ;;  %v618_v54 = vpop.f32.mrf.mxu1 }
 0x193   :  { %v648_v36 = vadd.f32 %v605_v51, %v2395_v20  ;;  %v649_v44 = vadd.f32 %v618_v54, %v2416_v61 }
 0x195   :  { %v1807_v40 = vmul.f32 -1.442695, %v648_v36  ;;  %v1808_v10 = vmul.f32 -1.442695, %v649_v44 }
 0x197   :  { %1902 = vpow2.f32 %v1807_v40 }
 0x198   :  { %1904 = vpow2.f32 %v1808_v10 }
 0x199   :  { %v631_v23 = vpop.f32.mrf.mxu2  ;;  %v644_v14 = vpop.f32.mrf.mxu3 }
 0x19a   :  { %v650_v57 = vadd.f32 %v631_v23, %v2397_v34  ;;  %v651_v3 = vadd.f32 %v644_v14, %v2399_v35  ;;  %v607_v29 = vpop.f32.mrf.mxu0  ;;  %v620_v6 = vpop.f32.mrf.mxu1 }
 0x19c   :  { %v1809_v47 = vmul.f32 -1.442695, %v650_v57  ;;  %v1810_v16 = vmul.f32 -1.442695, %v651_v3 }
 0x19d   :  { %v1903_v62 = vpop.eup %1902 }
 0x19e   :  { %v1905_v21 = vpop.eup %1904  ;;  %v664_v8 = vadd.f32 1.0, %v1903_v62  ;;  %1906 = vpow2.f32 %v1809_v47 }
 0x19f   :  { %v665_v20 = vadd.f32 1.0, %v1905_v21  ;;  %1908 = vpow2.f32 %v1810_v16 }
 0x1a0   :  { %1910 = vrcp.f32 %v664_v8  ;;  %vm673_vm8 = vweird.f32 %v664_v8 }
 0x1a1   :  { %1912 = vrcp.f32 %v665_v20  ;;  %v633_v61 = vpop.f32.mrf.mxu2  ;;  %v646_v19 = vpop.f32.mrf.mxu3  ;;  %vm688_vm4 = vweird.f32 %v665_v20  ;;  %v692_v6 = vand.u32 2147483647, %v665_v20  ;;  %v694_v47 = vand.u32 2147483648, %v665_v20 }
 0x1a2   :  { %v679_v19 = vand.u32 2147483648, %v664_v8 }
 0x1a3   :  { %vm693_vm12 = vcmp.eq.f32.partialorder %v692_v6, 8.507059e+37 }
 0x1a4   :  { %v1907_v22 = vpop.eup %1906 }
 0x1a5   :  { %v1909_v60 = vpop.eup %1908  ;;  %v666_v2 = vadd.f32 1.0, %v1907_v22 }
 0x1a6   :  { %v1911_v34 = vpop.eup %1910  ;;  %v667_v18 = vadd.f32 1.0, %v1909_v60  ;;  %v677_v60 = vand.u32 2147483647, %v664_v8 }
 0x1a7   :  { %v1913_v35 = vpop.eup %1912  ;;  %1914 = vrcp.f32 %v666_v2  ;;  %v669_v52 = vmul.f32 %v1911_v34, %v664_v8  ;;  %v709_v14 = vand.u32 2147483648, %v666_v2  ;;  %v707_v29 = vand.u32 2147483647, %v666_v2 }
 0x1a8   :  { %v684_v11 = vmul.f32 %v1913_v35, %v665_v20  ;;  %1916 = vrcp.f32 %v667_v18  ;;  %vm689_vm2 = vweird.f32 %v1913_v35  ;;  %vm674_vm5 = vweird.f32 %v1911_v34 }
 0x1a9   :  { %v670_v51 = vsub.f32 1.0, %v669_v52  ;;  %vm2506_vm6 = vmor %vm688_vm4, %vm689_vm2  ;;  %vm703_vm7 = vweird.f32 %v666_v2  ;;  %v710_v22 = vor.u32 1.1754944e-38, %v709_v14  ;;  %vm708_vm10 = vcmp.eq.f32.partialorder %v707_v29, 8.507059e+37 }
 0x1aa   :  { %v685_v13 = vsub.f32 1.0, %v684_v11  ;;  %vm675_vm11 = vmor %vm673_vm8, %vm674_vm5  ;;  %v695_v20 = vor.u32 1.1754944e-38, %v694_v47  ;;  %vm678_vm13 = vcmp.eq.f32.partialorder %v677_v60, 8.507059e+37  ;;  %vm718_vm15 = vweird.f32 %v667_v18 }
 0x1ab   :  { %v671_v10 = vmul.f32 %v1911_v34, %v670_v51 }
 0x1ac   :  { %v686_v36 = vmul.f32 %v1913_v35, %v685_v13 }
 0x1ad   :  { %v1915_v54 = vpop.eup %1914  ;;  %v672_v62 = vadd.f32 %v1911_v34, %v671_v10  ;;  %v680_v10 = vor.u32 1.1754944e-38, %v679_v19 }
 0x1ae   :  { %v699_v44 = vmul.f32 %v1915_v54, %v666_v2  ;;  %v1917_v40 = vpop.eup %1916  ;;  %v687_v57 = vadd.f32 %v1913_v35, %v686_v36  ;;  %vm704_vm3 = vweird.f32 %v1915_v54 }
 0x1af   :  { %v714_v16 = vmul.f32 %v1917_v40, %v667_v18  ;;  %vm705_vm9 = vmor %vm703_vm7, %vm704_vm3  ;;  %v676_v36 = vsel %vm675_vm11, %v1911_v34, %v672_v62  ;;  %vm719_vm14 = vweird.f32 %v1917_v40  ;;  %v722_v34 = vand.u32 2147483647, %v667_v18 }
 0x1b0   :  { %v700_v23 = vsub.f32 1.0, %v699_v44  ;;  %v691_v52 = vsel %vm2506_vm6, %v1913_v35, %v687_v57  ;;  %vm720_vm0 = vmor %vm718_vm15, %vm719_vm14 }
 0x1b1   :  { %v715_v51 = vsub.f32 1.0, %v714_v16  ;;  %vm723_vm1 = vcmp.eq.f32.partialorder %v722_v34, 8.507059e+37 }
 0x1b2   :  { %v701_v3 = vmul.f32 %v1915_v54, %v700_v23  ;;  %v696_v23 = vsel %vm693_vm12, %v695_v20, %v691_v52 }
 0x1b3   :  { %v716_v28 = vmul.f32 %v1917_v40, %v715_v51  ;;  %v730_v8 = vmul.f32 %v696_v23, %v2467_v46 }
 0x1b4   :  { %v702_v61 = vadd.f32 %v1915_v54, %v701_v3  ;;  %v681_v3 = vsel %vm678_vm13, %v680_v10, %v676_v36 }
 0x1b5   :  { %v717_v35 = vadd.f32 %v1917_v40, %v716_v28 }
 0x1b6   :  { %v706_v11 = vsel %vm705_vm9, %v1915_v54, %v702_v61  ;;  %v724_v54 = vand.u32 2147483648, %v667_v18 }
 0x1b7   :  { %v711_v13 = vsel %vm708_vm10, %v710_v22, %v706_v11  ;;  %v721_v57 = vsel %vm720_vm0, %v1917_v40, %v717_v35  ;;  %v2787_v40 = vld [vmem:[#allocation21_spill] sm:$0xff]  ;;  %v2788_v11 = vld [vmem:[#allocation15_spill] sm:$0xff] }
 0x1b8   :  { %v728_v44 = vmul.f32 2.0, %v711_v13  ;;  %v725_v29 = vor.u32 1.1754944e-38, %v724_v54  ;;  %v2789_v13 = vld [vmem:[#allocation16_spill] sm:$0xff] }
 0x1ba   :  { %v1811_v2 = vadd.f32 -1.0, %v728_v44  ;;  %v726_v47 = vsel %vm723_vm1, %v725_v29, %v721_v57 }
 0x1bc   :  { %v731_v14 = vmul.f32 %v1811_v2, %v681_v3 }
 0x1be   :  { %v2513_v21 = vadd.f32 %v731_v14, %v730_v8 }
 0x1c0   :  { %1918 = vtanh.f32 %v2513_v21 }
 0x1c6   :  { %v1919_v6 = vpop.eup %1918 }
 0x1c7   :  { %v734_v16 = vmul.f32 %v1919_v6, %v726_v47 }
 0x1c9   :  { %v739_v62 = vpack.c.bf16 %v734_v16, %v734_v16 }
 0x1cb   :  { %748 = vmatmul.bf16.vlgmr.msrb.gmra.mxu0 %v739_v62  ;;  %761 = vmatmul.bf16.vlgmr.msra.gmra.mxu1 %v739_v62 }
 0x1cc   :  { %774 = vmatmul.bf16.vlgmr.msrb.gmra.mxu2 %v739_v62  ;;  %787 = vmatmul.bf16.vlgmr.msrb.gmra.mxu3 %v739_v62 }
 0x1cd   :  { %1028 = vmatpush.bf16.msrb.mxu0 %v2182_v27  ;;  %1041 = vmatpush.bf16.msra.mxu1 %v2180_v26 }
 0x1ce   :  { %1054 = vmatpush.bf16.msrb.mxu2 %v2170_v17  ;;  %1067 = vmatpush.bf16.msrb.mxu3 %v2187_v31 }
 0x1d1   :  { %1029 = vmatpush.bf16.msrb.mxu0 %v2199_v38  ;;  %1042 = vmatpush.bf16.msra.mxu1 %v2201_v39 }
 0x1d2   :  { %1055 = vmatpush.bf16.msrb.mxu2 %v2185_v30  ;;  %1068 = vmatpush.bf16.msrb.mxu3 %v2207_v43 }
 0x1d5   :  { %1030 = vmatpush.bf16.msrb.mxu0 %v2211_v50  ;;  %1043 = vmatpush.bf16.msra.mxu1 %v2213_v53 }
 0x1d6   :  { %1056 = vmatpush.bf16.msrb.mxu2 %v2205_v42  ;;  %1069 = vmatpush.bf16.msrb.mxu3 %v2219_v56 }
 0x1d9   :  { %1031 = vmatpush.bf16.msrb.mxu0 %v2228_v0  ;;  %1044 = vmatpush.bf16.msra.mxu1 %v2231_v1 }
 0x1da   :  { %1057 = vmatpush.bf16.msrb.mxu2 %v2217_v55  ;;  %1070 = vmatpush.bf16.msrb.mxu3 %v2237_v5 }
 0x1dd   :  { %1032 = vmatpush.bf16.msrb.mxu0 %v2242_v9  ;;  %1045 = vmatpush.bf16.msra.mxu1 %v2262_v25 }
 0x1de   :  { %1058 = vmatpush.bf16.msrb.mxu2 %v2235_v4  ;;  %1071 = vmatpush.bf16.msrb.mxu3 %v2253_v15 }
 0x1e1   :  { %1033 = vmatpush.bf16.msrb.mxu0 %v2260_v24  ;;  %1046 = vmatpush.bf16.msra.mxu1 %v2271_v37 }
 0x1e2   :  { %1059 = vmatpush.bf16.msrb.mxu2 %v2247_v12  ;;  %1072 = vmatpush.bf16.msrb.mxu3 %v2266_v32 }
 0x1e5   :  { %1034 = vmatpush.bf16.msrb.mxu0 %v2274_v45  ;;  %1047 = vmatpush.bf16.msra.mxu1 %v2305_v63 }
 0x1e6   :  { %1060 = vmatpush.bf16.msrb.mxu2 %v2268_v33  ;;  %1073 = vmatpush.bf16.msrb.mxu3 %v2278_v48 }
 0x1e9   :  { %1035 = vmatpush.bf16.msrb.mxu0 %v2290_v58  ;;  %1048 = vmatpush.bf16.msra.mxu1 %v2310_v7 }
 0x1ea   :  { %1061 = vmatpush.bf16.msrb.mxu2 %v2280_v49  ;;  %1074 = vmatpush.bf16.msrb.mxu3 %v2294_v59 }
 0x248   :  { %v749_v28 = vpop.f32.mrf.mxu0  ;;  %v762_v46 = vpop.f32.mrf.mxu1 }
 0x249   :  { %v792_v18 = vadd.f32 %v749_v28, %v2404_v41  ;;  %v793_v61 = vadd.f32 %v762_v46, %v2787_v40 }
 0x24b   :  { %v1812_v19 = vmul.f32 -1.442695, %v792_v18  ;;  %v1813_v22 = vmul.f32 -1.442695, %v793_v61 }
 0x24d   :  { %1920 = vpow2.f32 %v1812_v19 }
 0x24e   :  { %1922 = vpow2.f32 %v1813_v22 }
 0x24f   :  { %v775_v60 = vpop.f32.mrf.mxu2  ;;  %v788_v52 = vpop.f32.mrf.mxu3 }
 0x250   :  { %v794_v20 = vadd.f32 %v775_v60, %v2788_v11  ;;  %v795_v51 = vadd.f32 %v788_v52, %v2789_v13  ;;  %v751_v36 = vpop.f32.mrf.mxu0  ;;  %v764_v44 = vpop.f32.mrf.mxu1 }
 0x252   :  { %v1814_v10 = vmul.f32 -1.442695, %v794_v20  ;;  %v1815_v23 = vmul.f32 -1.442695, %v795_v51 }
 0x253   :  { %v1921_v2 = vpop.eup %1920 }
 0x254   :  { %v1923_v3 = vpop.eup %1922  ;;  %v808_v8 = vadd.f32 1.0, %v1921_v2  ;;  %1924 = vpow2.f32 %v1814_v10 }
 0x255   :  { %v809_v41 = vadd.f32 1.0, %v1923_v3  ;;  %1926 = vpow2.f32 %v1815_v23 }
 0x256   :  { %1928 = vrcp.f32 %v808_v8  ;;  %vm817_vm8 = vweird.f32 %v808_v8  ;;  %v823_v3 = vand.u32 2147483648, %v808_v8 }
 0x257   :  { %1930 = vrcp.f32 %v809_v41  ;;  %v777_v14 = vpop.f32.mrf.mxu2  ;;  %v790_v35 = vpop.f32.mrf.mxu3  ;;  %vm832_vm4 = vweird.f32 %v809_v41  ;;  %v836_v51 = vand.u32 2147483647, %v809_v41  ;;  %v838_v36 = vand.u32 2147483648, %v809_v41 }
 0x258   :  { %v821_v35 = vand.u32 2147483647, %v808_v8 }
 0x259   :  { %vm837_vm12 = vcmp.eq.f32.partialorder %v836_v51, 8.507059e+37 }
 0x25a   :  { %v1925_v54 = vpop.eup %1924  ;;  %vm822_vm13 = vcmp.eq.f32.partialorder %v821_v35, 8.507059e+37 }
 0x25b   :  { %v1927_v34 = vpop.eup %1926  ;;  %v810_v57 = vadd.f32 1.0, %v1925_v54 }
 0x25c   :  { %v1929_v29 = vpop.eup %1928  ;;  %v811_v6 = vadd.f32 1.0, %v1927_v34 }
 0x25d   :  { %v1931_v47 = vpop.eup %1930  ;;  %1932 = vrcp.f32 %v810_v57  ;;  %v813_v16 = vmul.f32 %v1929_v29, %v808_v8  ;;  %v853_v52 = vand.u32 2147483648, %v810_v57  ;;  %v851_v13 = vand.u32 2147483647, %v810_v57 }
 0x25e   :  { %v828_v62 = vmul.f32 %v1931_v47, %v809_v41  ;;  %1934 = vrcp.f32 %v811_v6  ;;  %vm833_vm2 = vweird.f32 %v1931_v47  ;;  %vm818_vm5 = vweird.f32 %v1929_v29 }
 0x25f   :  { %v814_v46 = vsub.f32 1.0, %v813_v16  ;;  %vm2552_vm6 = vmor %vm832_vm4, %vm833_vm2  ;;  %vm847_vm7 = vweird.f32 %v810_v57  ;;  %v854_v14 = vor.u32 1.1754944e-38, %v853_v52  ;;  %vm852_vm10 = vcmp.eq.f32.partialorder %v851_v13, 8.507059e+37 }
 0x260   :  { %v829_v28 = vsub.f32 1.0, %v828_v62  ;;  %vm819_vm11 = vmor %vm817_vm8, %vm818_vm5  ;;  %v839_v41 = vor.u32 1.1754944e-38, %v838_v36  ;;  %vm862_vm15 = vweird.f32 %v811_v6 }
 0x261   :  { %v815_v22 = vmul.f32 %v1929_v29, %v814_v46 }
 0x262   :  { %v830_v40 = vmul.f32 %v1931_v47, %v829_v28 }
 0x263   :  { %v1933_v18 = vpop.eup %1932  ;;  %v816_v10 = vadd.f32 %v1929_v29, %v815_v22 }
 0x264   :  { %v843_v61 = vmul.f32 %v1933_v18, %v810_v57  ;;  %v1935_v19 = vpop.eup %1934  ;;  %v831_v11 = vadd.f32 %v1931_v47, %v830_v40  ;;  %vm848_vm3 = vweird.f32 %v1933_v18  ;;  %v824_v40 = vor.u32 1.1754944e-38, %v823_v3 }
 0x265   :  { %v858_v44 = vmul.f32 %v1935_v19, %v811_v6  ;;  %vm849_vm9 = vmor %vm847_vm7, %vm848_vm3  ;;  %v820_v28 = vsel %vm819_vm11, %v1929_v29, %v816_v10  ;;  %vm863_vm14 = vweird.f32 %v1935_v19  ;;  %v866_v29 = vand.u32 2147483647, %v811_v6 }
 0x266   :  { %v844_v60 = vsub.f32 1.0, %v843_v61  ;;  %v835_v54 = vsel %vm2552_vm6, %v1931_v47, %v831_v11  ;;  %v825_v22 = vsel %vm822_vm13, %v824_v40, %v820_v28  ;;  %vm864_vm0 = vmor %vm862_vm15, %vm863_vm14 }
 0x267   :  { %v859_v62 = vsub.f32 1.0, %v858_v44  ;;  %v840_v61 = vsel %vm837_vm12, %v839_v41, %v835_v54  ;;  %vm867_vm1 = vcmp.eq.f32.partialorder %v866_v29, 8.507059e+37  ;;  %v2794_v41 = vld [vmem:[#allocation18_spill] sm:$0xff] }
 0x268   :  { %v845_v20 = vmul.f32 %v1933_v18, %v844_v60  ;;  %v874_v8 = vmul.f32 %v840_v61, %v2513_v21 }
 0x269   :  { %v860_v60 = vmul.f32 %v1935_v19, %v859_v62  ;;  %v2795_v62 = vld [vmem:[#allocation19_spill] sm:$0xff] }
 0x26a   :  { %v846_v2 = vadd.f32 %v1933_v18, %v845_v20 }
 0x26b   :  { %v861_v47 = vadd.f32 %v1935_v19, %v860_v60 }
 0x26c   :  { %v850_v34 = vsel %vm849_vm9, %v1933_v18, %v846_v2  ;;  %v868_v18 = vand.u32 2147483648, %v811_v6  ;;  %v2793_v2 = vld [vmem:[#allocation25_spill] sm:$0xff] }
 0x26d   :  { %v855_v16 = vsel %vm852_vm10, %v854_v14, %v850_v34  ;;  %v865_v11 = vsel %vm864_vm0, %v1935_v19, %v861_v47  ;;  %v2792_v19 = vld [vmem:[#allocation17_spill] sm:$0xff] }
 0x26e   :  { %v872_v46 = vmul.f32 2.0, %v855_v16  ;;  %v869_v13 = vor.u32 1.1754944e-38, %v868_v18 }
 0x270   :  { %v1816_v57 = vadd.f32 -1.0, %v872_v46  ;;  %v870_v36 = vsel %vm867_vm1, %v869_v13, %v865_v11 }
 0x272   :  { %v875_v52 = vmul.f32 %v1816_v57, %v825_v22 }
 0x274   :  { %v2559_v20 = vadd.f32 %v875_v52, %v874_v8 }
 0x276   :  { %1936 = vtanh.f32 %v2559_v20 }
 0x27c   :  { %v1937_v51 = vpop.eup %1936 }
 0x27d   :  { %v878_v44 = vmul.f32 %v1937_v51, %v870_v36 }
 0x27f   :  { %v883_v10 = vpack.c.bf16 %v878_v44, %v878_v44 }
 0x281   :  { %892 = vmatmul.bf16.vlgmr.msra.gmra.mxu0 %v883_v10  ;;  %905 = vmatmul.bf16.vlgmr.msrb.gmra.mxu1 %v883_v10 }
 0x282   :  { %918 = vmatmul.bf16.vlgmr.msra.gmra.mxu2 %v883_v10  ;;  %931 = vmatmul.bf16.vlgmr.msra.gmra.mxu3 %v883_v10 }
 0x283   :  { %1172 = vmatpush.bf16.msra.mxu0 %v2182_v27  ;;  %1185 = vmatpush.bf16.msrb.mxu1 %v2180_v26 }
 0x284   :  { %1198 = vmatpush.bf16.msra.mxu2 %v2170_v17  ;;  %1211 = vmatpush.bf16.msra.mxu3 %v2187_v31 }
 0x287   :  { %1173 = vmatpush.bf16.msra.mxu0 %v2199_v38  ;;  %1186 = vmatpush.bf16.msrb.mxu1 %v2201_v39 }
 0x288   :  { %1199 = vmatpush.bf16.msra.mxu2 %v2185_v30  ;;  %1212 = vmatpush.bf16.msra.mxu3 %v2207_v43 }
 0x28b   :  { %1174 = vmatpush.bf16.msra.mxu0 %v2211_v50  ;;  %1187 = vmatpush.bf16.msrb.mxu1 %v2213_v53 }
 0x28c   :  { %1200 = vmatpush.bf16.msra.mxu2 %v2205_v42  ;;  %1213 = vmatpush.bf16.msra.mxu3 %v2219_v56 }
 0x28f   :  { %1175 = vmatpush.bf16.msra.mxu0 %v2228_v0  ;;  %1188 = vmatpush.bf16.msrb.mxu1 %v2231_v1 }
 0x290   :  { %1201 = vmatpush.bf16.msra.mxu2 %v2217_v55  ;;  %1214 = vmatpush.bf16.msra.mxu3 %v2237_v5 }
 0x293   :  { %1176 = vmatpush.bf16.msra.mxu0 %v2242_v9  ;;  %1189 = vmatpush.bf16.msrb.mxu1 %v2262_v25 }
 0x294   :  { %1202 = vmatpush.bf16.msra.mxu2 %v2235_v4  ;;  %1215 = vmatpush.bf16.msra.mxu3 %v2253_v15 }
 0x297   :  { %1177 = vmatpush.bf16.msra.mxu0 %v2260_v24  ;;  %1190 = vmatpush.bf16.msrb.mxu1 %v2271_v37 }
 0x298   :  { %1203 = vmatpush.bf16.msra.mxu2 %v2247_v12  ;;  %1216 = vmatpush.bf16.msra.mxu3 %v2266_v32 }
 0x29b   :  { %1178 = vmatpush.bf16.msra.mxu0 %v2274_v45  ;;  %1191 = vmatpush.bf16.msrb.mxu1 %v2305_v63 }
 0x29c   :  { %1204 = vmatpush.bf16.msra.mxu2 %v2268_v33  ;;  %1217 = vmatpush.bf16.msra.mxu3 %v2278_v48 }
 0x29f   :  { %1179 = vmatpush.bf16.msra.mxu0 %v2290_v58  ;;  %1192 = vmatpush.bf16.msrb.mxu1 %v2310_v7 }
 0x2a0   :  { %1205 = vmatpush.bf16.msra.mxu2 %v2280_v49  ;;  %1218 = vmatpush.bf16.msra.mxu3 %v2294_v59 }
 0x2fe   :  { %v893_v21 = vpop.f32.mrf.mxu0  ;;  %v906_v6 = vpop.f32.mrf.mxu1 }
 0x2ff   :  { %v936_v23 = vadd.f32 %v893_v21, %v2792_v19  ;;  %v937_v3 = vadd.f32 %v906_v6, %v2793_v2 }
 0x301   :  { %v1817_v14 = vmul.f32 -1.442695, %v936_v23  ;;  %v1818_v35 = vmul.f32 -1.442695, %v937_v3 }
 0x303   :  { %1938 = vpow2.f32 %v1817_v14 }
 0x304   :  { %1940 = vpow2.f32 %v1818_v35 }
 0x305   :  { %v919_v54 = vpop.f32.mrf.mxu2  ;;  %v932_v34 = vpop.f32.mrf.mxu3 }
 0x306   :  { %v938_v16 = vadd.f32 %v919_v54, %v2794_v41  ;;  %v939_v28 = vadd.f32 %v932_v34, %v2795_v62  ;;  %v895_v46 = vpop.f32.mrf.mxu0  ;;  %v908_v40 = vpop.f32.mrf.mxu1 }
 0x308   :  { %v1819_v61 = vmul.f32 -1.442695, %v938_v16  ;;  %v1820_v57 = vmul.f32 -1.442695, %v939_v28 }
 0x309   :  { %v1939_v22 = vpop.eup %1938 }
 0x30a   :  { %v1941_v60 = vpop.eup %1940  ;;  %v952_v8 = vadd.f32 1.0, %v1939_v22  ;;  %1942 = vpow2.f32 %v1819_v61 }
 0x30b   :  { %v953_v52 = vadd.f32 1.0, %v1941_v60  ;;  %1944 = vpow2.f32 %v1820_v57 }
 0x30c   :  { %1946 = vrcp.f32 %v952_v8  ;;  %vm961_vm8 = vweird.f32 %v952_v8  ;;  %v967_v60 = vand.u32 2147483648, %v952_v8 }
 0x30d   :  { %1948 = vrcp.f32 %v953_v52  ;;  %v921_v47 = vpop.f32.mrf.mxu2  ;;  %v934_v18 = vpop.f32.mrf.mxu3  ;;  %vm976_vm4 = vweird.f32 %v953_v52  ;;  %v980_v28 = vand.u32 2147483647, %v953_v52  ;;  %v982_v46 = vand.u32 2147483648, %v953_v52 }
 0x30e   :  { %v965_v18 = vand.u32 2147483647, %v952_v8 }
 0x30f   :  { %vm981_vm12 = vcmp.eq.f32.partialorder %v980_v28, 8.507059e+37 }
 0x310   :  { %v1943_v29 = vpop.eup %1942  ;;  %vm966_vm13 = vcmp.eq.f32.partialorder %v965_v18, 8.507059e+37 }
 0x311   :  { %v1945_v11 = vpop.eup %1944  ;;  %v954_v13 = vadd.f32 1.0, %v1943_v29 }
 0x312   :  { %v1947_v51 = vpop.eup %1946  ;;  %v955_v36 = vadd.f32 1.0, %v1945_v11 }
 0x313   :  { %v1949_v44 = vpop.eup %1948  ;;  %1950 = vrcp.f32 %v954_v13  ;;  %v957_v10 = vmul.f32 %v1947_v51, %v952_v8  ;;  %v997_v34 = vand.u32 2147483648, %v954_v13  ;;  %v995_v62 = vand.u32 2147483647, %v954_v13 }
 0x314   :  { %v972_v21 = vmul.f32 %v1949_v44, %v953_v52  ;;  %1952 = vrcp.f32 %v955_v36  ;;  %vm977_vm2 = vweird.f32 %v1949_v44  ;;  %vm962_vm5 = vweird.f32 %v1947_v51 }
 0x315   :  { %v958_v19 = vsub.f32 1.0, %v957_v10  ;;  %vm2598_vm6 = vmor %vm976_vm4, %vm977_vm2  ;;  %vm991_vm7 = vweird.f32 %v954_v13  ;;  %v998_v47 = vor.u32 1.1754944e-38, %v997_v34  ;;  %vm996_vm10 = vcmp.eq.f32.partialorder %v995_v62, 8.507059e+37 }
 0x316   :  { %v973_v6 = vsub.f32 1.0, %v972_v21  ;;  %vm963_vm11 = vmor %vm961_vm8, %vm962_vm5  ;;  %v983_v52 = vor.u32 1.1754944e-38, %v982_v46  ;;  %vm1006_vm15 = vweird.f32 %v955_v36 }
 0x317   :  { %v959_v35 = vmul.f32 %v1947_v51, %v958_v19 }
 0x318   :  { %v974_v2 = vmul.f32 %v1949_v44, %v973_v6 }
 0x319   :  { %v1951_v23 = vpop.eup %1950  ;;  %v960_v61 = vadd.f32 %v1947_v51, %v959_v35 }
 0x31a   :  { %v987_v3 = vmul.f32 %v1951_v23, %v954_v13  ;;  %v1953_v14 = vpop.eup %1952  ;;  %v975_v41 = vadd.f32 %v1949_v44, %v974_v2  ;;  %vm992_vm3 = vweird.f32 %v1951_v23  ;;  %v968_v2 = vor.u32 1.1754944e-38, %v967_v60 }
 0x31b   :  { %v1002_v40 = vmul.f32 %v1953_v14, %v955_v36  ;;  %vm993_vm9 = vmor %vm991_vm7, %vm992_vm3  ;;  %v964_v6 = vsel %vm963_vm11, %v1947_v51, %v960_v61  ;;  %vm1007_vm14 = vweird.f32 %v1953_v14  ;;  %v1010_v51 = vand.u32 2147483647, %v955_v36 }
 0x31c   :  { %v988_v54 = vsub.f32 1.0, %v987_v3  ;;  %v979_v29 = vsel %vm2598_vm6, %v1949_v44, %v975_v41  ;;  %v969_v35 = vsel %vm966_vm13, %v968_v2, %v964_v6  ;;  %vm1008_vm0 = vmor %vm1006_vm15, %vm1007_vm14 }
 0x31d   :  { %v1003_v21 = vsub.f32 1.0, %v1002_v40  ;;  %v984_v3 = vsel %vm981_vm12, %v983_v52, %v979_v29  ;;  %vm1011_vm1 = vcmp.eq.f32.partialorder %v1010_v51, 8.507059e+37  ;;  %v2800_v52 = vld [vmem:[#allocation22_spill] sm:$0xff] }
 0x31e   :  { %v989_v16 = vmul.f32 %v1951_v23, %v988_v54  ;;  %v1018_v8 = vmul.f32 %v984_v3, %v2559_v20 }
 0x31f   :  { %v1004_v54 = vmul.f32 %v1953_v14, %v1003_v21  ;;  %v2801_v21 = vld [vmem:[#allocation23_spill] sm:$0xff] }
 0x320   :  { %v990_v22 = vadd.f32 %v1951_v23, %v989_v16 }
 0x321   :  { %v1005_v44 = vadd.f32 %v1953_v14, %v1004_v54 }
 0x322   :  { %v994_v11 = vsel %vm993_vm9, %v1951_v23, %v990_v22  ;;  %v1012_v23 = vand.u32 2147483648, %v955_v36  ;;  %v2799_v22 = vld [vmem:[#allocation28_spill] sm:$0xff] }
 0x323   :  { %v999_v10 = vsel %vm996_vm10, %v998_v47, %v994_v11  ;;  %v1009_v41 = vsel %vm1008_vm0, %v1953_v14, %v1005_v44  ;;  %v2798_v14 = vld [vmem:[#allocation20_spill] sm:$0xff] }
 0x324   :  { %v1016_v19 = vmul.f32 2.0, %v999_v10  ;;  %v1013_v62 = vor.u32 1.1754944e-38, %v1012_v23 }
 0x326   :  { %v1821_v13 = vadd.f32 -1.0, %v1016_v19  ;;  %v1014_v46 = vsel %vm1011_vm1, %v1013_v62, %v1009_v41 }
 0x328   :  { %v1019_v34 = vmul.f32 %v1821_v13, %v969_v35 }
 0x32a   :  { %v2605_v16 = vadd.f32 %v1019_v34, %v1018_v8 }
 0x32c   :  { %1954 = vtanh.f32 %v2605_v16 }
 0x332   :  { %v1955_v28 = vpop.eup %1954 }
 0x333   :  { %v1022_v40 = vmul.f32 %v1955_v28, %v1014_v46 }
 0x335   :  { %v1027_v61 = vpack.c.bf16 %v1022_v40, %v1022_v40 }
 0x337   :  { %1036 = vmatmul.bf16.vlgmr.msrb.gmra.mxu0 %v1027_v61  ;;  %1049 = vmatmul.bf16.vlgmr.msra.gmra.mxu1 %v1027_v61 }
 0x338   :  { %1062 = vmatmul.bf16.vlgmr.msrb.gmra.mxu2 %v1027_v61  ;;  %1075 = vmatmul.bf16.vlgmr.msrb.gmra.mxu3 %v1027_v61 }
 0x339   :  { %1316 = vmatpush.bf16.msrb.mxu0 %v2182_v27  ;;  %1329 = vmatpush.bf16.msra.mxu1 %v2180_v26 }
 0x33a   :  { %1342 = vmatpush.bf16.msrb.mxu2 %v2170_v17  ;;  %1355 = vmatpush.bf16.msrb.mxu3 %v2187_v31 }
 0x33d   :  { %1317 = vmatpush.bf16.msrb.mxu0 %v2199_v38  ;;  %1330 = vmatpush.bf16.msra.mxu1 %v2201_v39 }
 0x33e   :  { %1343 = vmatpush.bf16.msrb.mxu2 %v2185_v30  ;;  %1356 = vmatpush.bf16.msrb.mxu3 %v2207_v43 }
 0x341   :  { %1318 = vmatpush.bf16.msrb.mxu0 %v2211_v50  ;;  %1331 = vmatpush.bf16.msra.mxu1 %v2213_v53 }
 0x342   :  { %1344 = vmatpush.bf16.msrb.mxu2 %v2205_v42  ;;  %1357 = vmatpush.bf16.msrb.mxu3 %v2219_v56 }
 0x345   :  { %1319 = vmatpush.bf16.msrb.mxu0 %v2228_v0  ;;  %1332 = vmatpush.bf16.msra.mxu1 %v2231_v1 }
 0x346   :  { %1345 = vmatpush.bf16.msrb.mxu2 %v2217_v55  ;;  %1358 = vmatpush.bf16.msrb.mxu3 %v2237_v5 }
 0x349   :  { %1320 = vmatpush.bf16.msrb.mxu0 %v2242_v9  ;;  %1333 = vmatpush.bf16.msra.mxu1 %v2262_v25 }
 0x34a   :  { %1346 = vmatpush.bf16.msrb.mxu2 %v2235_v4  ;;  %1359 = vmatpush.bf16.msrb.mxu3 %v2253_v15 }
 0x34d   :  { %1321 = vmatpush.bf16.msrb.mxu0 %v2260_v24  ;;  %1334 = vmatpush.bf16.msra.mxu1 %v2271_v37 }
 0x34e   :  { %1347 = vmatpush.bf16.msrb.mxu2 %v2247_v12  ;;  %1360 = vmatpush.bf16.msrb.mxu3 %v2266_v32 }
 0x351   :  { %1322 = vmatpush.bf16.msrb.mxu0 %v2274_v45  ;;  %1335 = vmatpush.bf16.msra.mxu1 %v2305_v63 }
 0x352   :  { %1348 = vmatpush.bf16.msrb.mxu2 %v2268_v33  ;;  %1361 = vmatpush.bf16.msrb.mxu3 %v2278_v48 }
 0x355   :  { %1323 = vmatpush.bf16.msrb.mxu0 %v2290_v58  ;;  %1336 = vmatpush.bf16.msra.mxu1 %v2310_v7 }
 0x356   :  { %1349 = vmatpush.bf16.msrb.mxu2 %v2280_v49  ;;  %1362 = vmatpush.bf16.msrb.mxu3 %v2294_v59 }
 0x3b4   :  { %v1037_v20 = vpop.f32.mrf.mxu0  ;;  %v1050_v36 = vpop.f32.mrf.mxu1 }
 0x3b5   :  { %v1080_v57 = vadd.f32 %v1037_v20, %v2798_v14  ;;  %v1081_v60 = vadd.f32 %v1050_v36, %v2799_v22 }
 0x3b7   :  { %v1822_v47 = vmul.f32 -1.442695, %v1080_v57  ;;  %v1823_v18 = vmul.f32 -1.442695, %v1081_v60 }
 0x3b9   :  { %1956 = vpow2.f32 %v1822_v47 }
 0x3ba   :  { %1958 = vpow2.f32 %v1823_v18 }
 0x3bb   :  { %v1063_v29 = vpop.f32.mrf.mxu2  ;;  %v1076_v11 = vpop.f32.mrf.mxu3 }
 0x3bc   :  { %v1082_v10 = vadd.f32 %v1063_v29, %v2800_v52  ;;  %v1083_v6 = vadd.f32 %v1076_v11, %v2801_v21  ;;  %v1039_v19 = vpop.f32.mrf.mxu0  ;;  %v1052_v2 = vpop.f32.mrf.mxu1 }
 0x3be   :  { %v1824_v3 = vmul.f32 -1.442695, %v1082_v10  ;;  %v1825_v13 = vmul.f32 -1.442695, %v1083_v6 }
 0x3bf   :  { %v1957_v35 = vpop.eup %1956 }
 0x3c0   :  { %v1959_v54 = vpop.eup %1958  ;;  %v1096_v8 = vadd.f32 1.0, %v1957_v35  ;;  %1960 = vpow2.f32 %v1824_v3 }
 0x3c1   :  { %v1097_v34 = vadd.f32 1.0, %v1959_v54  ;;  %1962 = vpow2.f32 %v1825_v13 }
 0x3c2   :  { %1964 = vrcp.f32 %v1096_v8  ;;  %vm1105_vm8 = vweird.f32 %v1096_v8  ;;  %v1111_v54 = vand.u32 2147483648, %v1096_v8 }
 0x3c3   :  { %1966 = vrcp.f32 %v1097_v34  ;;  %v1065_v44 = vpop.f32.mrf.mxu2  ;;  %v1078_v23 = vpop.f32.mrf.mxu3  ;;  %vm1120_vm4 = vweird.f32 %v1097_v34  ;;  %v1124_v6 = vand.u32 2147483647, %v1097_v34  ;;  %v1126_v19 = vand.u32 2147483648, %v1097_v34 }
 0x3c4   :  { %v1109_v23 = vand.u32 2147483647, %v1096_v8 }
 0x3c5   :  { %vm1125_vm12 = vcmp.eq.f32.partialorder %v1124_v6, 8.507059e+37 }
 0x3c6   :  { %v1961_v51 = vpop.eup %1960  ;;  %vm1110_vm13 = vcmp.eq.f32.partialorder %v1109_v23, 8.507059e+37 }
 0x3c7   :  { %v1963_v41 = vpop.eup %1962  ;;  %v1098_v62 = vadd.f32 1.0, %v1961_v51 }
 0x3c8   :  { %v1965_v28 = vpop.eup %1964  ;;  %v1099_v46 = vadd.f32 1.0, %v1963_v41 }
 0x3c9   :  { %v1967_v40 = vpop.eup %1966  ;;  %1968 = vrcp.f32 %v1098_v62  ;;  %v1101_v61 = vmul.f32 %v1965_v28, %v1096_v8  ;;  %v1141_v11 = vand.u32 2147483648, %v1098_v62  ;;  %v1139_v21 = vand.u32 2147483647, %v1098_v62 }
 0x3ca   :  { %v1116_v20 = vmul.f32 %v1967_v40, %v1097_v34  ;;  %1970 = vrcp.f32 %v1099_v46  ;;  %vm1121_vm2 = vweird.f32 %v1967_v40  ;;  %vm1106_vm5 = vweird.f32 %v1965_v28 }
 0x3cb   :  { %v1102_v14 = vsub.f32 1.0, %v1101_v61  ;;  %vm2644_vm6 = vmor %vm1120_vm4, %vm1121_vm2  ;;  %vm1135_vm7 = vweird.f32 %v1098_v62  ;;  %v1142_v44 = vor.u32 1.1754944e-38, %v1141_v11  ;;  %vm1140_vm10 = vcmp.eq.f32.partialorder %v1139_v21, 8.507059e+37 }
 0x3cc   :  { %v1117_v36 = vsub.f32 1.0, %v1116_v20  ;;  %vm1107_vm11 = vmor %vm1105_vm8, %vm1106_vm5  ;;  %v1127_v34 = vor.u32 1.1754944e-38, %v1126_v19  ;;  %vm1150_vm15 = vweird.f32 %v1099_v46 }
 0x3cd   :  { %v1103_v18 = vmul.f32 %v1965_v28, %v1102_v14 }
 0x3ce   :  { %v1118_v22 = vmul.f32 %v1967_v40, %v1117_v36 }
 0x3cf   :  { %v1969_v57 = vpop.eup %1968  ;;  %v1104_v3 = vadd.f32 %v1965_v28, %v1103_v18 }
 0x3d0   :  { %v1131_v60 = vmul.f32 %v1969_v57, %v1098_v62  ;;  %v1971_v47 = vpop.eup %1970  ;;  %v1119_v52 = vadd.f32 %v1967_v40, %v1118_v22  ;;  %vm1136_vm3 = vweird.f32 %v1969_v57  ;;  %v1112_v22 = vor.u32 1.1754944e-38, %v1111_v54 }
 0x3d1   :  { %v1146_v2 = vmul.f32 %v1971_v47, %v1099_v46  ;;  %vm1137_vm9 = vmor %vm1135_vm7, %vm1136_vm3  ;;  %v1108_v36 = vsel %vm1107_vm11, %v1965_v28, %v1104_v3  ;;  %vm1151_vm14 = vweird.f32 %v1971_v47  ;;  %v1154_v28 = vand.u32 2147483647, %v1099_v46 }
 0x3d2   :  { %v1132_v29 = vsub.f32 1.0, %v1131_v60  ;;  %v1123_v51 = vsel %vm2644_vm6, %v1967_v40, %v1119_v52  ;;  %v1113_v18 = vsel %vm1110_vm13, %v1112_v22, %v1108_v36  ;;  %vm1152_vm0 = vmor %vm1150_vm15, %vm1151_vm14 }
 0x3d3   :  { %v1147_v20 = vsub.f32 1.0, %v1146_v2  ;;  %v1128_v60 = vsel %vm1125_vm12, %v1127_v34, %v1123_v51  ;;  %vm1155_vm1 = vcmp.eq.f32.partialorder %v1154_v28, 8.507059e+37 }
 0x3d4   :  { %v1133_v10 = vmul.f32 %v1969_v57, %v1132_v29  ;;  %v1162_v8 = vmul.f32 %v1128_v60, %v2605_v16 }
 0x3d5   :  { %v1148_v29 = vmul.f32 %v1971_v47, %v1147_v20 }
 0x3d6   :  { %v1134_v35 = vadd.f32 %v1969_v57, %v1133_v10 }
 0x3d7   :  { %v1149_v40 = vadd.f32 %v1971_v47, %v1148_v29 }
 0x3d8   :  { %v1138_v41 = vsel %vm1137_vm9, %v1969_v57, %v1134_v35  ;;  %v1156_v57 = vand.u32 2147483648, %v1099_v46 }
 0x3d9   :  { %v1143_v61 = vsel %vm1140_vm10, %v1142_v44, %v1138_v41  ;;  %v1153_v52 = vsel %vm1152_vm0, %v1971_v47, %v1149_v40 }
 0x3da   :  { %v1160_v14 = vmul.f32 2.0, %v1143_v61  ;;  %v1157_v21 = vor.u32 1.1754944e-38, %v1156_v57 }
 0x3dc   :  { %v1826_v62 = vadd.f32 -1.0, %v1160_v14  ;;  %v1158_v19 = vsel %vm1155_vm1, %v1157_v21, %v1153_v52 }
 0x3de   :  { %v1163_v11 = vmul.f32 %v1826_v62, %v1113_v18 }
 0x3e0   :  { %v2651_v10 = vadd.f32 %v1163_v11, %v1162_v8 }
 0x3e2   :  { %1972 = vtanh.f32 %v2651_v10 }
 0x3e8   :  { %v1973_v6 = vpop.eup %1972 }
 0x3e9   :  { %v1166_v2 = vmul.f32 %v1973_v6, %v1158_v19 }
 0x3eb   :  { %v1171_v3 = vpack.c.bf16 %v1166_v2, %v1166_v2 }
 0x3ed   :  { %1180 = vmatmul.bf16.vlgmr.msra.gmra.mxu0 %v1171_v3  ;;  %1193 = vmatmul.bf16.vlgmr.msrb.gmra.mxu1 %v1171_v3 }
 0x3ee   :  { %1206 = vmatmul.bf16.vlgmr.msra.gmra.mxu2 %v1171_v3  ;;  %1219 = vmatmul.bf16.vlgmr.msra.gmra.mxu3 %v1171_v3 }
 0x3ef   :  { %1460 = vmatpush.bf16.msra.mxu0 %v2182_v27  ;;  %1473 = vmatpush.bf16.msrb.mxu1 %v2180_v26  ;;  %v2804_v27 = vld [vmem:[#allocation24_spill] sm:$0xff] }
 0x3f0   :  { %1486 = vmatpush.bf16.msra.mxu2 %v2170_v17  ;;  %1499 = vmatpush.bf16.msra.mxu3 %v2187_v31  ;;  %v2805_v31 = vld [vmem:[#allocation31_spill] sm:$0xff] }
 0x3f3   :  { %1461 = vmatpush.bf16.msra.mxu0 %v2199_v38  ;;  %1474 = vmatpush.bf16.msrb.mxu1 %v2201_v39 }
 0x3f4   :  { %1487 = vmatpush.bf16.msra.mxu2 %v2185_v30  ;;  %1500 = vmatpush.bf16.msra.mxu3 %v2207_v43 }
 0x3f7   :  { %1462 = vmatpush.bf16.msra.mxu0 %v2211_v50  ;;  %1475 = vmatpush.bf16.msrb.mxu1 %v2213_v53  ;;  %v2806_v53 = vld [vmem:[#allocation26_spill] sm:$0xff] }
 0x3f8   :  { %1488 = vmatpush.bf16.msra.mxu2 %v2205_v42  ;;  %1501 = vmatpush.bf16.msra.mxu3 %v2219_v56  ;;  %v2807_v56 = vld [vmem:[#allocation27_spill] sm:$0xff] }
 0x3fb   :  { %1463 = vmatpush.bf16.msra.mxu0 %v2228_v0  ;;  %1476 = vmatpush.bf16.msrb.mxu1 %v2231_v1 }
 0x3fc   :  { %1489 = vmatpush.bf16.msra.mxu2 %v2217_v55  ;;  %1502 = vmatpush.bf16.msra.mxu3 %v2237_v5 }
 0x3ff   :  { %1464 = vmatpush.bf16.msra.mxu0 %v2242_v9  ;;  %1477 = vmatpush.bf16.msrb.mxu1 %v2262_v25 }
 0x400   :  { %1490 = vmatpush.bf16.msra.mxu2 %v2235_v4  ;;  %1503 = vmatpush.bf16.msra.mxu3 %v2253_v15 }
 0x403   :  { %1465 = vmatpush.bf16.msra.mxu0 %v2260_v24  ;;  %1478 = vmatpush.bf16.msrb.mxu1 %v2271_v37 }
 0x404   :  { %1491 = vmatpush.bf16.msra.mxu2 %v2247_v12  ;;  %1504 = vmatpush.bf16.msra.mxu3 %v2266_v32 }
 0x407   :  { %1466 = vmatpush.bf16.msra.mxu0 %v2274_v45  ;;  %1479 = vmatpush.bf16.msrb.mxu1 %v2305_v63 }
 0x408   :  { %1492 = vmatpush.bf16.msra.mxu2 %v2268_v33  ;;  %1505 = vmatpush.bf16.msra.mxu3 %v2278_v48 }
 0x40b   :  { %1467 = vmatpush.bf16.msra.mxu0 %v2290_v58  ;;  %1480 = vmatpush.bf16.msrb.mxu1 %v2310_v7 }
 0x40c   :  { %1493 = vmatpush.bf16.msra.mxu2 %v2280_v49  ;;  %1506 = vmatpush.bf16.msra.mxu3 %v2294_v59 }
 0x46a   :  { %v1181_v17 = vpop.f32.mrf.mxu0  ;;  %v1194_v26 = vpop.f32.mrf.mxu1 }
 0x46b   :  { %v1224_v30 = vadd.f32 %v1181_v17, %v2804_v27  ;;  %v1225_v38 = vadd.f32 %v1194_v26, %v2805_v31 }
 0x46d   :  { %v1827_v39 = vmul.f32 -1.442695, %v1224_v30  ;;  %v1828_v42 = vmul.f32 -1.442695, %v1225_v38 }
 0x46f   :  { %1974 = vpow2.f32 %v1827_v39 }
 0x470   :  { %1976 = vpow2.f32 %v1828_v42 }
 0x471   :  { %v1207_v43 = vpop.f32.mrf.mxu2  ;;  %v1220_v50 = vpop.f32.mrf.mxu3 }
 0x472   :  { %v1226_v55 = vadd.f32 %v1207_v43, %v2806_v53  ;;  %v1227_v0 = vadd.f32 %v1220_v50, %v2807_v56  ;;  %v1183_v1 = vpop.f32.mrf.mxu0  ;;  %v1196_v4 = vpop.f32.mrf.mxu1 }
 0x473   :  { %v2810_v4 = vld [vmem:[#allocation13_spill] sm:$0xff] }
 0x474   :  { %v1829_v5 = vmul.f32 -1.442695, %v1226_v55  ;;  %v1830_v9 = vmul.f32 -1.442695, %v1227_v0 }
 0x475   :  { %v1975_v12 = vpop.eup %1974 }
 0x476   :  { %v1977_v15 = vpop.eup %1976  ;;  %v1240_v24 = vadd.f32 1.0, %v1975_v12  ;;  %1978 = vpow2.f32 %v1829_v5 }
 0x477   :  { %v1241_v25 = vadd.f32 1.0, %v1977_v15  ;;  %1980 = vpow2.f32 %v1830_v9  ;;  %v2811_v9 = vld [vmem:[#allocation34_spill] sm:$0xff] }
 0x478   :  { %1982 = vrcp.f32 %v1240_v24  ;;  %vm1249_vm8 = vweird.f32 %v1240_v24  ;;  %v1255_v18 = vand.u32 2147483648, %v1240_v24  ;;  %v1253_v8 = vand.u32 2147483647, %v1240_v24 }
 0x479   :  { %1984 = vrcp.f32 %v1241_v25  ;;  %v1209_v32 = vpop.f32.mrf.mxu2  ;;  %v1222_v33 = vpop.f32.mrf.mxu3  ;;  %vm1264_vm4 = vweird.f32 %v1241_v25  ;;  %v1268_v20 = vand.u32 2147483647, %v1241_v25  ;;  %v1270_v36 = vand.u32 2147483648, %v1241_v25 }
 0x47a   :  { %v1256_v19 = vor.u32 1.1754944e-38, %v1255_v18  ;;  %vm1254_vm13 = vcmp.eq.f32.partialorder %v1253_v8, 8.507059e+37  ;;  %v2812_v33 = vld [vmem:[#allocation29_spill] sm:$0xff] }
 0x47b   :  { %v1271_v57 = vor.u32 1.1754944e-38, %v1270_v36  ;;  %vm1269_vm12 = vcmp.eq.f32.partialorder %v1268_v20, 8.507059e+37 }
 0x47c   :  { %v1979_v37 = vpop.eup %1978 }
 0x47d   :  { %v1981_v45 = vpop.eup %1980  ;;  %v1242_v48 = vadd.f32 1.0, %v1979_v37 }
 0x47e   :  { %v1983_v49 = vpop.eup %1982  ;;  %v1243_v58 = vadd.f32 1.0, %v1981_v45  ;;  %v2813_v45 = vld [vmem:[#allocation30_spill] sm:$0xff] }
 0x47f   :  { %v1985_v59 = vpop.eup %1984  ;;  %1986 = vrcp.f32 %v1242_v48  ;;  %v1245_v63 = vmul.f32 %v1983_v49, %v1240_v24  ;;  %v1285_v51 = vand.u32 2147483648, %v1242_v48  ;;  %v1283_v61 = vand.u32 2147483647, %v1242_v48 }
 0x480   :  { %v1260_v7 = vmul.f32 %v1985_v59, %v1241_v25  ;;  %1988 = vrcp.f32 %v1243_v58  ;;  %vm1265_vm2 = vweird.f32 %v1985_v59  ;;  %vm1250_vm5 = vweird.f32 %v1983_v49 }
 0x481   :  { %v1246_v46 = vsub.f32 1.0, %v1245_v63  ;;  %vm2690_vm6 = vmor %vm1264_vm4, %vm1265_vm2  ;;  %vm1279_vm7 = vweird.f32 %v1242_v48  ;;  %v1286_v29 = vor.u32 1.1754944e-38, %v1285_v51  ;;  %vm1284_vm10 = vcmp.eq.f32.partialorder %v1283_v61, 8.507059e+37 }
 0x482   :  { %v1261_v16 = vsub.f32 1.0, %v1260_v7  ;;  %vm1251_vm11 = vmor %vm1249_vm8, %vm1250_vm5  ;;  %v1300_v39 = vand.u32 2147483648, %v1243_v58  ;;  %vm1294_vm15 = vweird.f32 %v1243_v58  ;;  %v1298_v42 = vand.u32 2147483647, %v1243_v58 }
 0x483   :  { %v1247_v44 = vmul.f32 %v1983_v49, %v1246_v46 }
 0x484   :  { %v1262_v13 = vmul.f32 %v1985_v59, %v1261_v16  ;;  %v1301_v50 = vor.u32 1.1754944e-38, %v1300_v39  ;;  %vm1299_vm1 = vcmp.eq.f32.partialorder %v1298_v42, 8.507059e+37 }
 0x485   :  { %v1987_v47 = vpop.eup %1986  ;;  %v1248_v22 = vadd.f32 %v1983_v49, %v1247_v44 }
 0x486   :  { %v1275_v35 = vmul.f32 %v1987_v47, %v1242_v48  ;;  %v1989_v54 = vpop.eup %1988  ;;  %v1263_v41 = vadd.f32 %v1985_v59, %v1262_v13  ;;  %vm1280_vm3 = vweird.f32 %v1987_v47 }
 0x487   :  { %v1290_v14 = vmul.f32 %v1989_v54, %v1243_v58  ;;  %vm1281_vm9 = vmor %vm1279_vm7, %vm1280_vm3  ;;  %v1252_v21 = vsel %vm1251_vm11, %v1983_v49, %v1248_v22  ;;  %vm1295_vm14 = vweird.f32 %v1989_v54 }
 0x488   :  { %v1276_v23 = vsub.f32 1.0, %v1275_v35  ;;  %v1267_v11 = vsel %vm2690_vm6, %v1985_v59, %v1263_v41  ;;  %v1257_v17 = vsel %vm1254_vm13, %v1256_v19, %v1252_v21  ;;  %vm1296_vm0 = vmor %vm1294_vm15, %vm1295_vm14 }
 0x489   :  { %v1291_v52 = vsub.f32 1.0, %v1290_v14  ;;  %v1272_v2 = vsel %vm1269_vm12, %v1271_v57, %v1267_v11 }
 0x48a   :  { %v1277_v34 = vmul.f32 %v1987_v47, %v1276_v23  ;;  %v1306_v27 = vmul.f32 %v1272_v2, %v2651_v10  ;;  %v1603_v2 = vld [vmem:[#allocation6 + $0x20] sm:$0xff] }
 0x48b   :  { %v1292_v26 = vmul.f32 %v1989_v54, %v1291_v52 }
 0x48c   :  { %v1278_v62 = vadd.f32 %v1987_v47, %v1277_v34 }
 0x48d   :  { %v1293_v38 = vadd.f32 %v1989_v54, %v1292_v26 }
 0x48e   :  { %v1282_v40 = vsel %vm1281_vm9, %v1987_v47, %v1278_v62 }
 0x48f   :  { %v1287_v28 = vsel %vm1284_vm10, %v1286_v29, %v1282_v40  ;;  %v1297_v43 = vsel %vm1296_vm0, %v1989_v54, %v1293_v38 }
 0x490   :  { %v1304_v6 = vmul.f32 2.0, %v1287_v28  ;;  %v1302_v55 = vsel %vm1299_vm1, %v1301_v50, %v1297_v43 }
 0x492   :  { %v1831_v3 = vadd.f32 -1.0, %v1304_v6 }
 0x494   :  { %v1307_v30 = vmul.f32 %v1831_v3, %v1257_v17 }
 0x496   :  { %v2697_v31 = vadd.f32 %v1307_v30, %v1306_v27 }
 0x498   :  { %1990 = vtanh.f32 %v2697_v31 }
 0x49e   :  { %v1991_v53 = vpop.eup %1990 }
 0x49f   :  { %v1310_v56 = vmul.f32 %v1991_v53, %v1302_v55 }
 0x4a1   :  { %v1315_v0 = vpack.c.bf16 %v1310_v56, %v1310_v56 }
 0x4a3   :  { %1324 = vmatmul.bf16.vlgmr.msrb.gmra.mxu0 %v1315_v0  ;;  %1337 = vmatmul.bf16.vlgmr.msra.gmra.mxu1 %v1315_v0 }
 0x4a4   :  { %1350 = vmatmul.bf16.vlgmr.msrb.gmra.mxu2 %v1315_v0  ;;  %1363 = vmatmul.bf16.vlgmr.msrb.gmra.mxu3 %v1315_v0 }
 0x520   :  { %v1325_v10 = vpop.f32.mrf.mxu0  ;;  %v1338_v1 = vpop.f32.mrf.mxu1 }
 0x521   :  { %v1368_v5 = vadd.f32 %v1325_v10, %v2810_v4  ;;  %v1369_v12 = vadd.f32 %v1338_v1, %v2811_v9 }
 0x523   :  { %v1832_v15 = vmul.f32 -1.442695, %v1368_v5  ;;  %v1833_v24 = vmul.f32 -1.442695, %v1369_v12 }
 0x525   :  { %1992 = vpow2.f32 %v1832_v15 }
 0x526   :  { %1994 = vpow2.f32 %v1833_v24 }
 0x527   :  { %v1351_v25 = vpop.f32.mrf.mxu2  ;;  %v1364_v32 = vpop.f32.mrf.mxu3 }
 0x528   :  { %v1370_v37 = vadd.f32 %v1351_v25, %v2812_v33  ;;  %v1371_v48 = vadd.f32 %v1364_v32, %v2813_v45  ;;  %v1327_v49 = vpop.f32.mrf.mxu0  ;;  %v1340_v58 = vpop.f32.mrf.mxu1 }
 0x529   :  { %v1613_v49 = vld [vmem:[#allocation6 + $0x70] sm:$0xff]  ;;  %v1612_v58 = vld [vmem:[#allocation6 + $0x68] sm:$0xff] }
 0x52a   :  { %v1834_v59 = vmul.f32 -1.442695, %v1370_v37  ;;  %v1835_v63 = vmul.f32 -1.442695, %v1371_v48 }
 0x52b   :  { %v1993_v7 = vpop.eup %1992 }
 0x52c   :  { %v1995_v16 = vpop.eup %1994  ;;  %v1384_v46 = vadd.f32 1.0, %v1993_v7  ;;  %1996 = vpow2.f32 %v1834_v59  ;;  %v2816_v59 = vld [vmem:[#allocation12_spill] sm:$0xff] }
 0x52d   :  { %v1385_v47 = vadd.f32 1.0, %v1995_v16  ;;  %1998 = vpow2.f32 %v1835_v63  ;;  %v2817_v63 = vld [vmem:[#allocation14_spill] sm:$0xff]  ;;  %v1611_v16 = vld [vmem:[#allocation6 + $0x60] sm:$0xff] }
 0x52e   :  { %2000 = vrcp.f32 %v1384_v46  ;;  %vm1393_vm8 = vweird.f32 %v1384_v46  ;;  %v1399_v17 = vand.u32 2147483648, %v1384_v46  ;;  %v1397_v27 = vand.u32 2147483647, %v1384_v46 }
 0x52f   :  { %2002 = vrcp.f32 %v1385_v47  ;;  %v1353_v13 = vpop.f32.mrf.mxu2  ;;  %v1366_v35 = vpop.f32.mrf.mxu3  ;;  %vm1408_vm4 = vweird.f32 %v1385_v47  ;;  %v1412_v52 = vand.u32 2147483647, %v1385_v47  ;;  %v1414_v21 = vand.u32 2147483648, %v1385_v47 }
 0x530   :  { %v1400_v55 = vor.u32 1.1754944e-38, %v1399_v17  ;;  %vm1398_vm13 = vcmp.eq.f32.partialorder %v1397_v27, 8.507059e+37  ;;  %v167_v7 = vadd.f32 %v2817_v63, %v2816_v59  ;;  %v2818_v35 = vld [vmem:[#allocation35_spill] sm:$0xff]  ;;  %v1601_v27 = vld [vmem:[#allocation6 + $0x10] sm:$0xff] }
 0x531   :  { %v1415_v39 = vor.u32 1.1754944e-38, %v1414_v21  ;;  %vm1413_vm12 = vcmp.eq.f32.partialorder %v1412_v52, 8.507059e+37  ;;  %v1604_v52 = vld [vmem:[#allocation6 + $0x28] sm:$0xff] }
 0x532   :  { %v1997_v54 = vpop.eup %1996 }
 0x533   :  { %v1999_v44 = vpop.eup %1998  ;;  %v1386_v23 = vadd.f32 1.0, %v1997_v54 }
 0x534   :  { %v2001_v51 = vpop.eup %2000  ;;  %v1387_v41 = vadd.f32 1.0, %v1999_v44  ;;  %v1610_v44 = vld [vmem:[#allocation6 + $0x58] sm:$0xff] }
 0x535   :  { %v2003_v34 = vpop.eup %2002  ;;  %2004 = vrcp.f32 %v1386_v23  ;;  %v1389_v61 = vmul.f32 %v2001_v51, %v1384_v46  ;;  %v1429_v11 = vand.u32 2147483648, %v1386_v23  ;;  %v1427_v28 = vand.u32 2147483647, %v1386_v23 }
 0x536   :  { %v1404_v20 = vmul.f32 %v2003_v34, %v1385_v47  ;;  %2006 = vrcp.f32 %v1387_v41  ;;  %vm1409_vm2 = vweird.f32 %v2003_v34  ;;  %vm1394_vm5 = vweird.f32 %v2001_v51 }
 0x537   :  { %v1390_v14 = vsub.f32 1.0, %v1389_v61  ;;  %vm2704_vm6 = vmor %vm1408_vm4, %vm1409_vm2  ;;  %vm1423_vm7 = vweird.f32 %v1386_v23  ;;  %v1430_v26 = vor.u32 1.1754944e-38, %v1429_v11  ;;  %vm1428_vm10 = vcmp.eq.f32.partialorder %v1427_v28, 8.507059e+37  ;;  %v1607_v61 = vld [vmem:[#allocation6 + $0x40] sm:$0xff]  ;;  %v1605_v11 = vld [vmem:[#allocation6 + $0x30] sm:$0xff] }
 0x538   :  { %v1405_v36 = vsub.f32 1.0, %v1404_v20  ;;  %vm1395_vm11 = vmor %vm1393_vm8, %vm1394_vm5  ;;  %v1444_v15 = vand.u32 2147483648, %v1387_v41  ;;  %vm1438_vm15 = vweird.f32 %v1387_v41  ;;  %v1442_v24 = vand.u32 2147483647, %v1387_v41 }
 0x539   :  { %v1391_v29 = vmul.f32 %v2001_v51, %v1390_v14  ;;  %v1606_v14 = vld [vmem:[#allocation6 + $0x38] sm:$0xff] }
 0x53a   :  { %v1406_v60 = vmul.f32 %v2003_v34, %v1405_v36  ;;  %v1445_v32 = vor.u32 1.1754944e-38, %v1444_v15  ;;  %vm1443_vm1 = vcmp.eq.f32.partialorder %v1442_v24, 8.507059e+37 }
 0x53b   :  { %v2005_v22 = vpop.eup %2004  ;;  %v1392_v19 = vadd.f32 %v2001_v51, %v1391_v29 }
 0x53c   :  { %v1419_v62 = vmul.f32 %v2005_v22, %v1386_v23  ;;  %v2007_v18 = vpop.eup %2006  ;;  %v1407_v40 = vadd.f32 %v2003_v34, %v1406_v60  ;;  %vm1424_vm3 = vweird.f32 %v2005_v22 }
 0x53d   :  { %v1434_v6 = vmul.f32 %v2007_v18, %v1387_v41  ;;  %vm1425_vm9 = vmor %vm1423_vm7, %vm1424_vm3  ;;  %v1396_v50 = vsel %vm1395_vm11, %v2001_v51, %v1392_v19  ;;  %vm1439_vm14 = vweird.f32 %v2007_v18  ;;  %v1609_v41 = vld [vmem:[#allocation6 + $0x50] sm:$0xff] }
 0x53e   :  { %v1420_v8 = vsub.f32 1.0, %v1419_v62  ;;  %v1411_v30 = vsel %vm2704_vm6, %v2003_v34, %v1407_v40  ;;  %v1401_v10 = vsel %vm1398_vm13, %v1400_v55, %v1396_v50  ;;  %vm1440_vm0 = vmor %vm1438_vm15, %vm1439_vm14  ;;  %v1608_v34 = vld [vmem:[#allocation6 + $0x48] sm:$0xff]  ;;  %v2820_v62 = vld [vmem:[#allocation33_spill] sm:$0xff] }
 0x53f   :  { %v1435_v43 = vsub.f32 1.0, %v1434_v6  ;;  %v1416_v56 = vsel %vm1413_vm12, %v1415_v39, %v1411_v30  ;;  %v1599_v55 = vld [vmem:[#allocation6] sm:$0xff] }
 0x540   :  { %v1421_v57 = vmul.f32 %v2005_v22, %v1420_v8  ;;  %v1450_v4 = vmul.f32 %v1416_v56, %v2697_v31  ;;  %v1614_v31 = vld [vmem:[#allocation6 + $0x78] sm:$0xff] }
 0x541   :  { %v1436_v1 = vmul.f32 %v2007_v18, %v1435_v43  ;;  %1619 = vmatpush.msrb.mxu0 %v1614_v31 }
 0x542   :  { %v1422_v3 = vadd.f32 %v2005_v22, %v1421_v57 }
 0x543   :  { %v1437_v12 = vadd.f32 %v2007_v18, %v1436_v1  ;;  %1620 = vmatpush.msrb.mxu0 %v1613_v49 }
 0x544   :  { %v1426_v38 = vsel %vm1425_vm9, %v2005_v22, %v1422_v3  ;;  %v2819_v22 = vld [vmem:[#allocation32_spill] sm:$0xff] }
 0x545   :  { %v1431_v42 = vsel %vm1428_vm10, %v1430_v26, %v1426_v38  ;;  %v1441_v25 = vsel %vm1440_vm0, %v2007_v18, %v1437_v12  ;;  %1621 = vmatpush.msrb.mxu0 %v1612_v58  ;;  %v1602_v26 = vld [vmem:[#allocation6 + $0x18] sm:$0xff] }
 0x546   :  { %v1448_v53 = vmul.f32 2.0, %v1431_v42  ;;  %v1446_v37 = vsel %vm1443_vm1, %v1445_v32, %v1441_v25  ;;  %v1600_v42 = vld [vmem:[#allocation6 + $0x8] sm:$0xff] }
 0x547   :  { %1622 = vmatpush.msrb.mxu0 %v1611_v16 }
 0x548   :  { %v1836_v0 = vadd.f32 -1.0, %v1448_v53 }
 0x549   :  { %1623 = vmatpush.msrb.mxu0 %v1610_v44 }
 0x54a   :  { %v1451_v5 = vmul.f32 %v1836_v0, %v1401_v10 }
 0x54b   :  { %1624 = vmatpush.msrb.mxu0 %v1609_v41 }
 0x54c   :  { %v2711_v9 = vadd.f32 %v1451_v5, %v1450_v4 }
 0x54d   :  { %1625 = vmatpush.msrb.mxu0 %v1608_v34 }
 0x54e   :  { %2008 = vtanh.f32 %v2711_v9 }
 0x54f   :  { %1626 = vmatpush.msrb.mxu0 %v1607_v61 }
 0x551   :  { %1627 = vmatpush.msrb.mxu0 %v1606_v14 }
 0x553   :  { %1628 = vmatpush.msrb.mxu0 %v1605_v11 }
 0x554   :  { %v2009_v33 = vpop.eup %2008 }
 0x555   :  { %v1454_v45 = vmul.f32 %v2009_v33, %v1446_v37  ;;  %1629 = vmatpush.msrb.mxu0 %v1604_v52 }
 0x557   :  { %v1459_v48 = vpack.c.bf16 %v1454_v45, %v1454_v45  ;;  %1630 = vmatpush.msrb.mxu0 %v1603_v2 }
 0x559   :  { %1468 = vmatmul.bf16.vlgmr.msra.gmra.mxu0 %v1459_v48  ;;  %1481 = vmatmul.bf16.vlgmr.msrb.gmra.mxu1 %v1459_v48 }
 0x55a   :  { %1494 = vmatmul.bf16.vlgmr.msra.gmra.mxu2 %v1459_v48  ;;  %1507 = vmatmul.bf16.vlgmr.msra.gmra.mxu3 %v1459_v48 }
 0x55b   :  { %1631 = vmatpush.msrb.mxu0 %v1602_v26 }
 0x55d   :  { %1632 = vmatpush.msrb.mxu0 %v1601_v27 }
 0x55f   :  { %1633 = vmatpush.msrb.mxu0 %v1600_v42 }
 0x561   :  { %1634 = vmatpush.msrb.mxu0 %v1599_v55 }
 0x5d6   :  { %v1469_v46 = vpop.f32.mrf.mxu0  ;;  %v1482_v47 = vpop.f32.mrf.mxu1 }
 0x5d7   :  { %v1512_v13 = vadd.f32 %v1469_v46, %v167_v7  ;;  %v1513_v54 = vadd.f32 %v1482_v47, %v2818_v35 }
 0x5d9   :  { %v1837_v23 = vmul.f32 -1.442695, %v1512_v13  ;;  %v1838_v51 = vmul.f32 -1.442695, %v1513_v54 }
 0x5db   :  { %2010 = vpow2.f32 %v1837_v23 }
 0x5dc   :  { %2012 = vpow2.f32 %v1838_v51 }
 0x5dd   :  { %v1495_v20 = vpop.f32.mrf.mxu2  ;;  %v1508_v36 = vpop.f32.mrf.mxu3 }
 0x5de   :  { %v1514_v60 = vadd.f32 %v1495_v20, %v2819_v22  ;;  %v1515_v18 = vadd.f32 %v1508_v36, %v2820_v62  ;;  %v1471_v29 = vpop.f32.mrf.mxu0  ;;  %v1484_v8 = vpop.f32.mrf.mxu1 }
 0x5e0   :  { %v1839_v40 = vmul.f32 -1.442695, %v1514_v60  ;;  %v1840_v57 = vmul.f32 -1.442695, %v1515_v18 }
 0x5e1   :  { %v2011_v28 = vpop.eup %2010 }
 0x5e2   :  { %v2013_v21 = vpop.eup %2012  ;;  %v2719_v6 = vadd.f32 1.0, %v2011_v28  ;;  %2014 = vpow2.f32 %v1839_v40 }
 0x5e3   :  { %v2721_v19 = vadd.f32 1.0, %v2013_v21  ;;  %2016 = vpow2.f32 %v1840_v57 }
 0x5e4   :  { %2018 = vrcp.f32 %v2719_v6  ;;  %vm1537_vm8 = vweird.f32 %v2719_v6  ;;  %v1543_v7 = vand.u32 2147483648, %v2719_v6  ;;  %v1541_v46 = vand.u32 2147483647, %v2719_v6 }
 0x5e5   :  { %2020 = vrcp.f32 %v2721_v19  ;;  %v1497_v3 = vpop.f32.mrf.mxu2  ;;  %v1510_v17 = vpop.f32.mrf.mxu3  ;;  %vm1552_vm4 = vweird.f32 %v2721_v19  ;;  %v1556_v48 = vand.u32 2147483647, %v2721_v19  ;;  %v1558_v31 = vand.u32 2147483648, %v2721_v19 }
 0x5e6   :  { %v1544_v41 = vor.u32 1.1754944e-38, %v1543_v7  ;;  %vm1542_vm13 = vcmp.eq.f32.partialorder %v1541_v46, 8.507059e+37 }
 0x5e7   :  { %v1559_v35 = vor.u32 1.1754944e-38, %v1558_v31  ;;  %vm1557_vm12 = vcmp.eq.f32.partialorder %v1556_v48, 8.507059e+37 }
 0x5e8   :  { %v2015_v30 = vpop.eup %2014 }
 0x5e9   :  { %v2017_v38 = vpop.eup %2016  ;;  %v1530_v39 = vadd.f32 1.0, %v2015_v30 }
 0x5ea   :  { %v2019_v43 = vpop.eup %2018  ;;  %v2725_v50 = vadd.f32 1.0, %v2017_v38 }
 0x5eb   :  { %v2021_v53 = vpop.eup %2020  ;;  %2022 = vrcp.f32 %v1530_v39  ;;  %v1533_v56 = vmul.f32 %v2019_v43, %v2719_v6  ;;  %v1573_v32 = vand.u32 2147483648, %v1530_v39  ;;  %v1571_v45 = vand.u32 2147483647, %v1530_v39 }
 0x5ec   :  { %v1548_v0 = vmul.f32 %v2021_v53, %v2721_v19  ;;  %2024 = vrcp.f32 %v2725_v50  ;;  %vm1553_vm2 = vweird.f32 %v2021_v53  ;;  %vm1538_vm5 = vweird.f32 %v2019_v43 }
 0x5ed   :  { %v1534_v1 = vsub.f32 1.0, %v1533_v56  ;;  %vm2734_vm6 = vmor %vm1552_vm4, %vm1553_vm2  ;;  %vm1567_vm7 = vweird.f32 %v1530_v39  ;;  %v1574_v16 = vor.u32 1.1754944e-38, %v1573_v32  ;;  %vm1572_vm10 = vcmp.eq.f32.partialorder %v1571_v45, 8.507059e+37 }
 0x5ee   :  { %v1549_v10 = vsub.f32 1.0, %v1548_v0  ;;  %vm1539_vm11 = vmor %vm1537_vm8, %vm1538_vm5  ;;  %v1588_v18 = vand.u32 2147483648, %v2725_v50  ;;  %vm1582_vm15 = vweird.f32 %v2725_v50  ;;  %v1586_v29 = vand.u32 2147483647, %v2725_v50 }
 0x5ef   :  { %v1535_v24 = vmul.f32 %v2019_v43, %v1534_v1 }
 0x5f0   :  { %v1550_v5 = vmul.f32 %v2021_v53, %v1549_v10  ;;  %v1589_v11 = vor.u32 1.1754944e-38, %v1588_v18  ;;  %vm1587_vm1 = vcmp.eq.f32.partialorder %v1586_v29, 8.507059e+37 }
 0x5f1   :  { %v2023_v4 = vpop.eup %2022  ;;  %v1536_v58 = vadd.f32 %v2019_v43, %v1535_v24 }
 0x5f2   :  { %v1563_v12 = vmul.f32 %v2023_v4, %v1530_v39  ;;  %v2025_v15 = vpop.eup %2024  ;;  %v1551_v33 = vadd.f32 %v2021_v53, %v1550_v5  ;;  %vm1568_vm3 = vweird.f32 %v2023_v4 }
 0x5f3   :  { %v1578_v49 = vmul.f32 %v2025_v15, %v2725_v50  ;;  %vm1569_vm9 = vmor %vm1567_vm7, %vm1568_vm3  ;;  %v1540_v23 = vsel %vm1539_vm11, %v2019_v43, %v1536_v58  ;;  %vm1583_vm14 = vweird.f32 %v2025_v15 }
 0x5f4   :  { %v1564_v25 = vsub.f32 1.0, %v1563_v12  ;;  %v1555_v47 = vsel %vm2734_vm6, %v2021_v53, %v1551_v33  ;;  %v1545_v20 = vsel %vm1542_vm13, %v1544_v41, %v1540_v23  ;;  %vm1584_vm0 = vmor %vm1582_vm15, %vm1583_vm14 }
 0x5f5   :  { %v1579_v44 = vsub.f32 1.0, %v1578_v49  ;;  %v1560_v34 = vsel %vm1557_vm12, %v1559_v35, %v1555_v47 }
 0x5f6   :  { %v1565_v37 = vmul.f32 %v2023_v4, %v1564_v25  ;;  %v1594_v14 = vmul.f32 %v1560_v34, %v2711_v9  ;;  %v1883_v9 = vld [vmem:[%s2758_s5] ss:$0 sm:$0xff] }
 0x5f7   :  { %v1580_v36 = vmul.f32 %v2025_v15, %v1579_v44 }
 0x5f8   :  { %v1566_v63 = vadd.f32 %v2023_v4, %v1565_v37 }
 0x5f9   :  { %v1581_v62 = vadd.f32 %v2025_v15, %v1580_v36 }
 0x5fa   :  { %v1570_v13 = vsel %vm1569_vm9, %v2023_v4, %v1566_v63 }
 0x5fb   :  { %v1575_v54 = vsel %vm1572_vm10, %v1574_v16, %v1570_v13  ;;  %v1585_v8 = vsel %vm1584_vm0, %v2025_v15, %v1581_v62 }
 0x5fc   :  { %v1592_v51 = vmul.f32 2.0, %v1575_v54  ;;  %v1590_v57 = vsel %vm1587_vm1, %v1589_v11, %v1585_v8 }
 0x5fe   :  { %v1841_v61 = vadd.f32 -1.0, %v1592_v51 }
 0x600   :  { %v1595_v22 = vmul.f32 %v1841_v61, %v1545_v20 }
 0x602   :  { %v1596_v60 = vadd.f32 %v1595_v22, %v1594_v14 }
 0x604   :  { %2026 = vtanh.f32 %v1596_v60 }
 0x60a   :  { %v2027_v40 = vpop.eup %2026 }
 0x60b   :  { %v1598_v28 = vmul.f32 %v2027_v40, %v1590_v57 }
 0x60d   :  { %1635 = vmatmul.f32.vlgmr.msrb.gmra.mxu0 %v1598_v28 }
 0x68a   :  { %v1636_v52 = vpop.f32.mrf.mxu0 }
 0x68b   :  { %v1637_v21 = vadd.f32 %v1883_v9, %v1636_v52 }
 0x68d   :  { %1639 = vst [vmem:[#allocation8] sm:$0xff] %v1637_v21 }
 0x68e   :  { %1650 = dma.vmem_to_hbm [thread:$0]  %s1646_s29, 128, %s1648_s8, [#allocation5]  }
 0x68f   :  { %2104 = dma.done.wait [#allocation5], 128  }
 0x690   :  { %2105 = vsyncadd [#allocation5], 4294967168 }
 0x691   :  { %1655 = vsyncpa [#allocation4], 1 }
 0x692   :  { %1656 = vsyncpa [#allocation7], 1 }
 0x693   :  { %1657 = vsyncpa [#allocation5], 1 }

</bundles_post_ra>
